<compile_context>
chip_gen: v5e
topology: v5e:2x2
jax: 0.10.0
libtpu: 0.0.40
codegen_flags: <defaults>
</compile_context>

<pallas_src>
import jax
import jax.numpy as jnp
from jax.experimental import pallas as pl
from jax.experimental.pallas import tpu as pltpu


# ------------------------------ fused model kernel ------------------------------
def _make_fused_kernel(B, T, V, H, num_layers):
    F32 = jnp.float32

    def kernel(*refs):
        # refs = [x_tm, w_ih0, w_hh0, b0,
        #         (w_cat_l, b_l) for l in 1..L-1,
        #         fc_w, fc_b, o_ref]
        x_ref, w_ih0_ref, w_hh0_ref, b0_ref = refs[0:4]
        rest = refs[4:]
        w_cat_refs = [rest[2 * (l - 1)] for l in range(1, num_layers)]
        b_refs = [rest[2 * (l - 1) + 1] for l in range(1, num_layers)]
        fc_w_ref = rest[-3]   # (1, H)
        fc_b_ref = rest[-2]   # (1, 1)
        o_ref = rest[-1]      # (B, 1)

        # Per-lane activation constants for the fused gate nonlinearity:
        #   act = s * tanh(s * gates) + b
        #   i/f/o lanes: s = 0.5, b = 0.5  (== sigmoid)
        #   g lanes    : s = 1.0, b = 0.0  (== tanh)
        lane = jax.lax.broadcasted_iota(jnp.int32, (1, 4 * H), 1)
        is_g = (lane >= 2 * H) & (lane < 3 * H)
        s_vec = jnp.where(is_g, 1.0, 0.5).astype(F32)
        b_vec = jnp.where(is_g, 0.0, 0.5).astype(F32)

        def cell_update(gates, c_prev):
            act = s_vec * jnp.tanh(s_vec * gates) + b_vec      # one EUP tanh, full vreg
            i_g = act[:, 0 * H:1 * H]
            f_g = act[:, 1 * H:2 * H]
            g_g = act[:, 2 * H:3 * H]
            o_g = act[:, 3 * H:4 * H]
            c_new = f_g * c_prev + i_g * g_g
            h_new = o_g * jnp.tanh(c_new)
            return h_new, c_new

        # Hoisted layer-0 input projection: one matmul for all timesteps, off the
        # serial recurrence.
        gx0 = jnp.dot(x_ref[...], w_ih0_ref[...],
                      preferred_element_type=F32) + b0_ref[...]          # (T*B, 4H)
        w_hh0 = w_hh0_ref[...]                                           # (H, 4H)
        w_cats = [r[...] for r in w_cat_refs]                            # (2H, 4H) each
        biases = [r[...] for r in b_refs]                                # (1, 4H) each

        h = [jnp.zeros((B, H), F32) for _ in range(num_layers)]
        c = [jnp.zeros((B, H), F32) for _ in range(num_layers)]

        # Wavefront over (time, layer): layer l at step t depends only on layer l-1
        # at step t and layer l at step t-1.  Descending layer order within a wave
        # reads layer l-1's hidden state from the previous wave before it is updated.
        for wave in range(T + num_layers - 1):
            for l in range(num_layers - 1, -1, -1):
                t = wave - l
                if t < 0 or t >= T:
                    continue
                if l == 0:
                    gates = gx0[t * B:(t + 1) * B, :] + jnp.dot(
                        h[0], w_hh0, preferred_element_type=F32)
                else:
                    xin = jnp.concatenate([h[l - 1], h[l]], axis=1)      # (B, 2H)
                    gates = jnp.dot(xin, w_cats[l - 1],
                                    preferred_element_type=F32) + biases[l - 1]
                h[l], c[l] = cell_update(gates, c[l])

        h_last = h[num_layers - 1]                                       # out[:, -1, :]
        # FC head as elementwise mul + lane reduction (avoids a lane-sparse (H,1) matmul).
        logits = jnp.sum(h_last * fc_w_ref[...], axis=-1, keepdims=True) + fc_b_ref[...]
        o_ref[...] = jax.nn.sigmoid(logits).astype(o_ref.dtype)

    return kernel


def lstm_discriminator_forward(x, params):
    """x: (B, T, vocab_size), batch_first like PyTorch. Returns (B, 1) probabilities."""
    B, T, V = x.shape
    H = params["fc_w"].shape[1]
    num_layers = len(params["lstm"])

    # Time-major slab built on the wrapper side (cheap XLA work, keeps the XLU
    # relayouts out of the serial kernel).
    x_tm = jnp.transpose(x.astype(jnp.float32), (1, 0, 2)).reshape(T * B, V)

    w_ih0, w_hh0, b0 = params["lstm"][0]
    args = [x_tm, w_ih0, w_hh0, b0]
    for (w_ih, w_hh, bias) in params["lstm"][1:]:
        # Stack input/recurrent weights so layers >= 1 use a single per-step matmul.
        args.append(jnp.concatenate([w_ih, w_hh], axis=0))               # (2H, 4H)
        args.append(bias)                                                # (1, 4H)
    args += [params["fc_w"], params["fc_b"]]

    kernel = _make_fused_kernel(B, T, V, H, num_layers)
    return pl.pallas_call(
        kernel,
        out_shape=jax.ShapeDtypeStruct((B, 1), jnp.float32),
        # Gridless single invocation; pin everything in VMEM explicitly.
        in_specs=[pl.BlockSpec(memory_space=pltpu.MemorySpace.VMEM) for _ in args],
        out_specs=pl.BlockSpec(memory_space=pltpu.MemorySpace.VMEM),
    )(*args)


# ---------------------------------- params ----------------------------------
def init_params(key, hidden_dim, num_layers, vocab_size):
    """Deterministic init mimicking PyTorch nn.LSTM / nn.Linear U(-1/sqrt(H), 1/sqrt(H))."""
    params = {"lstm": []}
    bound = 1.0 / float(hidden_dim) ** 0.5
    keys = jax.random.split(key, 4 * num_layers + 2)
    for layer in range(num_layers):
        d_in = vocab_size if layer == 0 else hidden_dim
        k0, k1, k2, k3 = keys[4 * layer:4 * layer + 4]
        # Stored transposed relative to PyTorch: (D_in, 4H) / (H, 4H); gate order i, f, g, o.
        w_ih = jax.random.uniform(k0, (d_in, 4 * hidden_dim), jnp.float32, -bound, bound)
        w_hh = jax.random.uniform(k1, (hidden_dim, 4 * hidden_dim), jnp.float32, -bound, bound)
        b_ih = jax.random.uniform(k2, (4 * hidden_dim,), jnp.float32, -bound, bound)
        b_hh = jax.random.uniform(k3, (4 * hidden_dim,), jnp.float32, -bound, bound)
        params["lstm"].append((w_ih, w_hh, (b_ih + b_hh)[None, :]))
    # FC weight stored as a (1, H) row so the head is a multiply + lane reduction.
    params["fc_w"] = jax.random.uniform(keys[-2], (1, hidden_dim), jnp.float32, -bound, bound)
    params["fc_b"] = jax.random.uniform(keys[-1], (1, 1), jnp.float32, -bound, bound)
    return params


# ------------------------------ pure-JAX reference ------------------------------
def reference_forward(x, params, hidden_dim):
    B = x.shape[0]
    layer_in = jnp.transpose(x, (1, 0, 2)).astype(jnp.float32)   # (T, B, V)
    for (w_ih, w_hh, bias) in params["lstm"]:
        def step(carry, x_t):
            h, c = carry
            gates = x_t @ w_ih + h @ w_hh + bias[0]
            i, f, g, o = jnp.split(gates, 4, axis=-1)
            i, f, o = jax.nn.sigmoid(i), jax.nn.sigmoid(f), jax.nn.sigmoid(o)
            g = jnp.tanh(g)
            c = f * c + i * g
            h = o * jnp.tanh(c)
            return (h, c), h
        init = (jnp.zeros((B, hidden_dim), jnp.float32),
                jnp.zeros((B, hidden_dim), jnp.float32))
        _, layer_in = jax.lax.scan(step, init, layer_in)
    h_last = layer_in[-1]
    return jax.nn.sigmoid(h_last @ params["fc_w"].T + params["fc_b"])


if __name__ == "__main__":
    hidden_dim, num_layers, max_length, vocab_size = 32, 2, 8, 16
    batch = 8

    key = jax.random.PRNGKey(0)
    k_param, k_x = jax.random.split(key)
    params = init_params(k_param, hidden_dim, num_layers, vocab_size)

    # Generated/real "sequences": (B, T, vocab_size) soft one-hots.
    x = jax.nn.softmax(
        jax.random.normal(k_x, (batch, max_length, vocab_size), jnp.float32), axis=-1)

    out = lstm_discriminator_forward(x, params)
    out = jax.block_until_ready(out)

    ref = jax.block_until_ready(reference_forward(x, params, hidden_dim))
    assert out.shape == (batch, 1), out.shape
    assert jnp.allclose(out, ref, atol=1e-4, rtol=1e-4), (out, ref)

    print("KERNEL_OK")
</pallas_src>

<mosaic_0001>
module attributes {stable_mosaic.version = 11 : i64} {
  func.func @kernel(%arg0: memref<64x16xf32, #tpu.memory_space<vmem>>, %arg1: memref<16x128xf32, #tpu.memory_space<vmem>>, %arg2: memref<32x128xf32, #tpu.memory_space<vmem>>, %arg3: memref<1x128xf32, #tpu.memory_space<vmem>>, %arg4: memref<64x128xf32, #tpu.memory_space<vmem>>, %arg5: memref<1x128xf32, #tpu.memory_space<vmem>>, %arg6: memref<1x32xf32, #tpu.memory_space<vmem>>, %arg7: memref<1x1xf32, #tpu.memory_space<vmem>>, %arg8: memref<8x1xf32, #tpu.memory_space<vmem>>) attributes {dimension_semantics = [], scalar_prefetch = 0 : i64, scratch_operands = 0 : i64, tpu.core_type = #tpu.core_type<tc>} {
    %0 = tpu.iota {dimensions = array<i32: 1>} : vector<1x128xi32>
    %c64_i32 = arith.constant 64 : i32
    %1 = vector.broadcast %c64_i32 : i32 to vector<1x128xi32>
    %2 = arith.cmpi sge, %0, %1 : vector<1x128xi32>
    %c96_i32 = arith.constant 96 : i32
    %3 = vector.broadcast %c96_i32 : i32 to vector<1x128xi32>
    %4 = arith.cmpi slt, %0, %3 : vector<1x128xi32>
    %5 = arith.andi %2, %4 : vector<1x128xi1>
    %cst = arith.constant 1.000000e+00 : f32
    %cst_0 = arith.constant 5.000000e-01 : f32
    %6 = vector.broadcast %cst : f32 to vector<1x128xf32>
    %7 = vector.broadcast %cst_0 : f32 to vector<1x128xf32>
    %8 = arith.select %5, %6, %7 : vector<1x128xi1>, vector<1x128xf32>
    %cst_1 = arith.constant 0.000000e+00 : f32
    %cst_2 = arith.constant 5.000000e-01 : f32
    %9 = vector.broadcast %cst_1 : f32 to vector<1x128xf32>
    %10 = vector.broadcast %cst_2 : f32 to vector<1x128xf32>
    %11 = arith.select %5, %9, %10 : vector<1x128xi1>, vector<1x128xf32>
    %c0 = arith.constant 0 : index
    %c0_3 = arith.constant 0 : index
    %12 = vector.load %arg0[%c0, %c0_3] : memref<64x16xf32, #tpu.memory_space<vmem>>, vector<64x16xf32>
    %c0_4 = arith.constant 0 : index
    %c0_5 = arith.constant 0 : index
    %13 = vector.load %arg1[%c0_4, %c0_5] : memref<16x128xf32, #tpu.memory_space<vmem>>, vector<16x128xf32>
    %cst_6 = arith.constant dense<0.000000e+00> : vector<64x128xf32>
    %14 = tpu.matmul %12, %13, %cst_6 {dimension_numbers = #tpu.dot_dimension_numbers<[1], [0], [0], [1], [0, 0, 1, 1], [], []>} : vector<64x16xf32>, vector<16x128xf32>, vector<64x128xf32> -> vector<64x128xf32>
    %c0_7 = arith.constant 0 : index
    %c0_8 = arith.constant 0 : index
    %15 = vector.load %arg3[%c0_7, %c0_8] : memref<1x128xf32, #tpu.memory_space<vmem>>, vector<1x128xf32>
    %16 = vector.broadcast %15 : vector<1x128xf32> to vector<64x128xf32>
    %17 = arith.addf %14, %16 : vector<64x128xf32>
    %c0_9 = arith.constant 0 : index
    %c0_10 = arith.constant 0 : index
    %18 = vector.load %arg2[%c0_9, %c0_10] : memref<32x128xf32, #tpu.memory_space<vmem>>, vector<32x128xf32>
    %c0_11 = arith.constant 0 : index
    %c0_12 = arith.constant 0 : index
    %19 = vector.load %arg4[%c0_11, %c0_12] : memref<64x128xf32, #tpu.memory_space<vmem>>, vector<64x128xf32>
    %c0_13 = arith.constant 0 : index
    %c0_14 = arith.constant 0 : index
    %20 = vector.load %arg5[%c0_13, %c0_14] : memref<1x128xf32, #tpu.memory_space<vmem>>, vector<1x128xf32>
    %cst_15 = arith.constant 0.000000e+00 : f32
    %21 = vector.broadcast %cst_15 : f32 to vector<8x32xf32>
    %cst_16 = arith.constant 0.000000e+00 : f32
    %22 = vector.broadcast %cst_16 : f32 to vector<8x32xf32>
    %cst_17 = arith.constant 0.000000e+00 : f32
    %23 = vector.broadcast %cst_17 : f32 to vector<8x32xf32>
    %cst_18 = arith.constant 0.000000e+00 : f32
    %24 = vector.broadcast %cst_18 : f32 to vector<8x32xf32>
    %25 = vector.extract_strided_slice %17 {offsets = [0, 0], sizes = [8, 128], strides = [1, 1]} : vector<64x128xf32> to vector<8x128xf32>
    %cst_19 = arith.constant dense<0.000000e+00> : vector<8x128xf32>
    %26 = tpu.matmul %21, %18, %cst_19 {dimension_numbers = #tpu.dot_dimension_numbers<[1], [0], [0], [1], [0, 0, 1, 1], [], []>} : vector<8x32xf32>, vector<32x128xf32>, vector<8x128xf32> -> vector<8x128xf32>
    %27 = arith.addf %25, %26 : vector<8x128xf32>
    %28 = vector.broadcast %8 : vector<1x128xf32> to vector<8x128xf32>
    %29 = arith.mulf %28, %27 : vector<8x128xf32>
    %30 = math.tanh %29 : vector<8x128xf32>
    %31 = vector.broadcast %8 : vector<1x128xf32> to vector<8x128xf32>
    %32 = arith.mulf %31, %30 : vector<8x128xf32>
    %33 = vector.broadcast %11 : vector<1x128xf32> to vector<8x128xf32>
    %34 = arith.addf %32, %33 : vector<8x128xf32>
    %35 = vector.extract_strided_slice %34 {offsets = [0, 0], sizes = [8, 32], strides = [1, 1]} : vector<8x128xf32> to vector<8x32xf32>
    %36 = vector.extract_strided_slice %34 {offsets = [0, 32], sizes = [8, 32], strides = [1, 1]} : vector<8x128xf32> to vector<8x32xf32>
    %37 = vector.extract_strided_slice %34 {offsets = [0, 64], sizes = [8, 32], strides = [1, 1]} : vector<8x128xf32> to vector<8x32xf32>
    %38 = vector.extract_strided_slice %34 {offsets = [0, 96], sizes = [8, 32], strides = [1, 1]} : vector<8x128xf32> to vector<8x32xf32>
    %39 = arith.mulf %36, %23 : vector<8x32xf32>
    %40 = arith.mulf %35, %37 : vector<8x32xf32>
    %41 = arith.addf %39, %40 : vector<8x32xf32>
    %42 = math.tanh %41 : vector<8x32xf32>
    %43 = arith.mulf %38, %42 : vector<8x32xf32>
    %44 = tpu.concatenate %43, %22 in 1 : vector<8x32xf32>, vector<8x32xf32> -> vector<8x64xf32>
    %cst_20 = arith.constant dense<0.000000e+00> : vector<8x128xf32>
    %45 = tpu.matmul %44, %19, %cst_20 {dimension_numbers = #tpu.dot_dimension_numbers<[1], [0], [0], [1], [0, 0, 1, 1], [], []>} : vector<8x64xf32>, vector<64x128xf32>, vector<8x128xf32> -> vector<8x128xf32>
    %46 = vector.broadcast %20 : vector<1x128xf32> to vector<8x128xf32>
    %47 = arith.addf %45, %46 : vector<8x128xf32>
    %48 = vector.broadcast %8 : vector<1x128xf32> to vector<8x128xf32>
    %49 = arith.mulf %48, %47 : vector<8x128xf32>
    %50 = math.tanh %49 : vector<8x128xf32>
    %51 = vector.broadcast %8 : vector<1x128xf32> to vector<8x128xf32>
    %52 = arith.mulf %51, %50 : vector<8x128xf32>
    %53 = vector.broadcast %11 : vector<1x128xf32> to vector<8x128xf32>
    %54 = arith.addf %52, %53 : vector<8x128xf32>
    %55 = vector.extract_strided_slice %54 {offsets = [0, 0], sizes = [8, 32], strides = [1, 1]} : vector<8x128xf32> to vector<8x32xf32>
    %56 = vector.extract_strided_slice %54 {offsets = [0, 32], sizes = [8, 32], strides = [1, 1]} : vector<8x128xf32> to vector<8x32xf32>
    %57 = vector.extract_strided_slice %54 {offsets = [0, 64], sizes = [8, 32], strides = [1, 1]} : vector<8x128xf32> to vector<8x32xf32>
    %58 = vector.extract_strided_slice %54 {offsets = [0, 96], sizes = [8, 32], strides = [1, 1]} : vector<8x128xf32> to vector<8x32xf32>
    %59 = arith.mulf %56, %24 : vector<8x32xf32>
    %60 = arith.mulf %55, %57 : vector<8x32xf32>
    %61 = arith.addf %59, %60 : vector<8x32xf32>
    %62 = math.tanh %61 : vector<8x32xf32>
    %63 = arith.mulf %58, %62 : vector<8x32xf32>
    %64 = vector.extract_strided_slice %17 {offsets = [8, 0], sizes = [8, 128], strides = [1, 1]} : vector<64x128xf32> to vector<8x128xf32>
    %cst_21 = arith.constant dense<0.000000e+00> : vector<8x128xf32>
    %65 = tpu.matmul %43, %18, %cst_21 {dimension_numbers = #tpu.dot_dimension_numbers<[1], [0], [0], [1], [0, 0, 1, 1], [], []>} : vector<8x32xf32>, vector<32x128xf32>, vector<8x128xf32> -> vector<8x128xf32>
    %66 = arith.addf %64, %65 : vector<8x128xf32>
    %67 = vector.broadcast %8 : vector<1x128xf32> to vector<8x128xf32>
    %68 = arith.mulf %67, %66 : vector<8x128xf32>
    %69 = math.tanh %68 : vector<8x128xf32>
    %70 = vector.broadcast %8 : vector<1x128xf32> to vector<8x128xf32>
    %71 = arith.mulf %70, %69 : vector<8x128xf32>
    %72 = vector.broadcast %11 : vector<1x128xf32> to vector<8x128xf32>
    %73 = arith.addf %71, %72 : vector<8x128xf32>
    %74 = vector.extract_strided_slice %73 {offsets = [0, 0], sizes = [8, 32], strides = [1, 1]} : vector<8x128xf32> to vector<8x32xf32>
    %75 = vector.extract_strided_slice %73 {offsets = [0, 32], sizes = [8, 32], strides = [1, 1]} : vector<8x128xf32> to vector<8x32xf32>
    %76 = vector.extract_strided_slice %73 {offsets = [0, 64], sizes = [8, 32], strides = [1, 1]} : vector<8x128xf32> to vector<8x32xf32>
    %77 = vector.extract_strided_slice %73 {offsets = [0, 96], sizes = [8, 32], strides = [1, 1]} : vector<8x128xf32> to vector<8x32xf32>
    %78 = arith.mulf %75, %41 : vector<8x32xf32>
    %79 = arith.mulf %74, %76 : vector<8x32xf32>
    %80 = arith.addf %78, %79 : vector<8x32xf32>
    %81 = math.tanh %80 : vector<8x32xf32>
    %82 = arith.mulf %77, %81 : vector<8x32xf32>
    %83 = tpu.concatenate %82, %63 in 1 : vector<8x32xf32>, vector<8x32xf32> -> vector<8x64xf32>
    %cst_22 = arith.constant dense<0.000000e+00> : vector<8x128xf32>
    %84 = tpu.matmul %83, %19, %cst_22 {dimension_numbers = #tpu.dot_dimension_numbers<[1], [0], [0], [1], [0, 0, 1, 1], [], []>} : vector<8x64xf32>, vector<64x128xf32>, vector<8x128xf32> -> vector<8x128xf32>
    %85 = vector.broadcast %20 : vector<1x128xf32> to vector<8x128xf32>
    %86 = arith.addf %84, %85 : vector<8x128xf32>
    %87 = vector.broadcast %8 : vector<1x128xf32> to vector<8x128xf32>
    %88 = arith.mulf %87, %86 : vector<8x128xf32>
    %89 = math.tanh %88 : vector<8x128xf32>
    %90 = vector.broadcast %8 : vector<1x128xf32> to vector<8x128xf32>
    %91 = arith.mulf %90, %89 : vector<8x128xf32>
    %92 = vector.broadcast %11 : vector<1x128xf32> to vector<8x128xf32>
    %93 = arith.addf %91, %92 : vector<8x128xf32>
    %94 = vector.extract_strided_slice %93 {offsets = [0, 0], sizes = [8, 32], strides = [1, 1]} : vector<8x128xf32> to vector<8x32xf32>
    %95 = vector.extract_strided_slice %93 {offsets = [0, 32], sizes = [8, 32], strides = [1, 1]} : vector<8x128xf32> to vector<8x32xf32>
    %96 = vector.extract_strided_slice %93 {offsets = [0, 64], sizes = [8, 32], strides = [1, 1]} : vector<8x128xf32> to vector<8x32xf32>
    %97 = vector.extract_strided_slice %93 {offsets = [0, 96], sizes = [8, 32], strides = [1, 1]} : vector<8x128xf32> to vector<8x32xf32>
    %98 = arith.mulf %95, %61 : vector<8x32xf32>
    %99 = arith.mulf %94, %96 : vector<8x32xf32>
    %100 = arith.addf %98, %99 : vector<8x32xf32>
    %101 = math.tanh %100 : vector<8x32xf32>
    %102 = arith.mulf %97, %101 : vector<8x32xf32>
    %103 = vector.extract_strided_slice %17 {offsets = [16, 0], sizes = [8, 128], strides = [1, 1]} : vector<64x128xf32> to vector<8x128xf32>
    %cst_23 = arith.constant dense<0.000000e+00> : vector<8x128xf32>
    %104 = tpu.matmul %82, %18, %cst_23 {dimension_numbers = #tpu.dot_dimension_numbers<[1], [0], [0], [1], [0, 0, 1, 1], [], []>} : vector<8x32xf32>, vector<32x128xf32>, vector<8x128xf32> -> vector<8x128xf32>
    %105 = arith.addf %103, %104 : vector<8x128xf32>
    %106 = vector.broadcast %8 : vector<1x128xf32> to vector<8x128xf32>
    %107 = arith.mulf %106, %105 : vector<8x128xf32>
    %108 = math.tanh %107 : vector<8x128xf32>
    %109 = vector.broadcast %8 : vector<1x128xf32> to vector<8x128xf32>
    %110 = arith.mulf %109, %108 : vector<8x128xf32>
    %111 = vector.broadcast %11 : vector<1x128xf32> to vector<8x128xf32>
    %112 = arith.addf %110, %111 : vector<8x128xf32>
    %113 = vector.extract_strided_slice %112 {offsets = [0, 0], sizes = [8, 32], strides = [1, 1]} : vector<8x128xf32> to vector<8x32xf32>
    %114 = vector.extract_strided_slice %112 {offsets = [0, 32], sizes = [8, 32], strides = [1, 1]} : vector<8x128xf32> to vector<8x32xf32>
    %115 = vector.extract_strided_slice %112 {offsets = [0, 64], sizes = [8, 32], strides = [1, 1]} : vector<8x128xf32> to vector<8x32xf32>
    %116 = vector.extract_strided_slice %112 {offsets = [0, 96], sizes = [8, 32], strides = [1, 1]} : vector<8x128xf32> to vector<8x32xf32>
    %117 = arith.mulf %114, %80 : vector<8x32xf32>
    %118 = arith.mulf %113, %115 : vector<8x32xf32>
    %119 = arith.addf %117, %118 : vector<8x32xf32>
    %120 = math.tanh %119 : vector<8x32xf32>
    %121 = arith.mulf %116, %120 : vector<8x32xf32>
    %122 = tpu.concatenate %121, %102 in 1 : vector<8x32xf32>, vector<8x32xf32> -> vector<8x64xf32>
    %cst_24 = arith.constant dense<0.000000e+00> : vector<8x128xf32>
    %123 = tpu.matmul %122, %19, %cst_24 {dimension_numbers = #tpu.dot_dimension_numbers<[1], [0], [0], [1], [0, 0, 1, 1], [], []>} : vector<8x64xf32>, vector<64x128xf32>, vector<8x128xf32> -> vector<8x128xf32>
    %124 = vector.broadcast %20 : vector<1x128xf32> to vector<8x128xf32>
    %125 = arith.addf %123, %124 : vector<8x128xf32>
    %126 = vector.broadcast %8 : vector<1x128xf32> to vector<8x128xf32>
    %127 = arith.mulf %126, %125 : vector<8x128xf32>
    %128 = math.tanh %127 : vector<8x128xf32>
    %129 = vector.broadcast %8 : vector<1x128xf32> to vector<8x128xf32>
    %130 = arith.mulf %129, %128 : vector<8x128xf32>
    %131 = vector.broadcast %11 : vector<1x128xf32> to vector<8x128xf32>
    %132 = arith.addf %130, %131 : vector<8x128xf32>
    %133 = vector.extract_strided_slice %132 {offsets = [0, 0], sizes = [8, 32], strides = [1, 1]} : vector<8x128xf32> to vector<8x32xf32>
    %134 = vector.extract_strided_slice %132 {offsets = [0, 32], sizes = [8, 32], strides = [1, 1]} : vector<8x128xf32> to vector<8x32xf32>
    %135 = vector.extract_strided_slice %132 {offsets = [0, 64], sizes = [8, 32], strides = [1, 1]} : vector<8x128xf32> to vector<8x32xf32>
    %136 = vector.extract_strided_slice %132 {offsets = [0, 96], sizes = [8, 32], strides = [1, 1]} : vector<8x128xf32> to vector<8x32xf32>
    %137 = arith.mulf %134, %100 : vector<8x32xf32>
    %138 = arith.mulf %133, %135 : vector<8x32xf32>
    %139 = arith.addf %137, %138 : vector<8x32xf32>
    %140 = math.tanh %139 : vector<8x32xf32>
    %141 = arith.mulf %136, %140 : vector<8x32xf32>
    %142 = vector.extract_strided_slice %17 {offsets = [24, 0], sizes = [8, 128], strides = [1, 1]} : vector<64x128xf32> to vector<8x128xf32>
    %cst_25 = arith.constant dense<0.000000e+00> : vector<8x128xf32>
    %143 = tpu.matmul %121, %18, %cst_25 {dimension_numbers = #tpu.dot_dimension_numbers<[1], [0], [0], [1], [0, 0, 1, 1], [], []>} : vector<8x32xf32>, vector<32x128xf32>, vector<8x128xf32> -> vector<8x128xf32>
    %144 = arith.addf %142, %143 : vector<8x128xf32>
    %145 = vector.broadcast %8 : vector<1x128xf32> to vector<8x128xf32>
    %146 = arith.mulf %145, %144 : vector<8x128xf32>
    %147 = math.tanh %146 : vector<8x128xf32>
    %148 = vector.broadcast %8 : vector<1x128xf32> to vector<8x128xf32>
    %149 = arith.mulf %148, %147 : vector<8x128xf32>
    %150 = vector.broadcast %11 : vector<1x128xf32> to vector<8x128xf32>
    %151 = arith.addf %149, %150 : vector<8x128xf32>
    %152 = vector.extract_strided_slice %151 {offsets = [0, 0], sizes = [8, 32], strides = [1, 1]} : vector<8x128xf32> to vector<8x32xf32>
    %153 = vector.extract_strided_slice %151 {offsets = [0, 32], sizes = [8, 32], strides = [1, 1]} : vector<8x128xf32> to vector<8x32xf32>
    %154 = vector.extract_strided_slice %151 {offsets = [0, 64], sizes = [8, 32], strides = [1, 1]} : vector<8x128xf32> to vector<8x32xf32>
    %155 = vector.extract_strided_slice %151 {offsets = [0, 96], sizes = [8, 32], strides = [1, 1]} : vector<8x128xf32> to vector<8x32xf32>
    %156 = arith.mulf %153, %119 : vector<8x32xf32>
    %157 = arith.mulf %152, %154 : vector<8x32xf32>
    %158 = arith.addf %156, %157 : vector<8x32xf32>
    %159 = math.tanh %158 : vector<8x32xf32>
    %160 = arith.mulf %155, %159 : vector<8x32xf32>
    %161 = tpu.concatenate %160, %141 in 1 : vector<8x32xf32>, vector<8x32xf32> -> vector<8x64xf32>
    %cst_26 = arith.constant dense<0.000000e+00> : vector<8x128xf32>
    %162 = tpu.matmul %161, %19, %cst_26 {dimension_numbers = #tpu.dot_dimension_numbers<[1], [0], [0], [1], [0, 0, 1, 1], [], []>} : vector<8x64xf32>, vector<64x128xf32>, vector<8x128xf32> -> vector<8x128xf32>
    %163 = vector.broadcast %20 : vector<1x128xf32> to vector<8x128xf32>
    %164 = arith.addf %162, %163 : vector<8x128xf32>
    %165 = vector.broadcast %8 : vector<1x128xf32> to vector<8x128xf32>
    %166 = arith.mulf %165, %164 : vector<8x128xf32>
    %167 = math.tanh %166 : vector<8x128xf32>
    %168 = vector.broadcast %8 : vector<1x128xf32> to vector<8x128xf32>
    %169 = arith.mulf %168, %167 : vector<8x128xf32>
    %170 = vector.broadcast %11 : vector<1x128xf32> to vector<8x128xf32>
    %171 = arith.addf %169, %170 : vector<8x128xf32>
    %172 = vector.extract_strided_slice %171 {offsets = [0, 0], sizes = [8, 32], strides = [1, 1]} : vector<8x128xf32> to vector<8x32xf32>
    %173 = vector.extract_strided_slice %171 {offsets = [0, 32], sizes = [8, 32], strides = [1, 1]} : vector<8x128xf32> to vector<8x32xf32>
    %174 = vector.extract_strided_slice %171 {offsets = [0, 64], sizes = [8, 32], strides = [1, 1]} : vector<8x128xf32> to vector<8x32xf32>
    %175 = vector.extract_strided_slice %171 {offsets = [0, 96], sizes = [8, 32], strides = [1, 1]} : vector<8x128xf32> to vector<8x32xf32>
    %176 = arith.mulf %173, %139 : vector<8x32xf32>
    %177 = arith.mulf %172, %174 : vector<8x32xf32>
    %178 = arith.addf %176, %177 : vector<8x32xf32>
    %179 = math.tanh %178 : vector<8x32xf32>
    %180 = arith.mulf %175, %179 : vector<8x32xf32>
    %181 = vector.extract_strided_slice %17 {offsets = [32, 0], sizes = [8, 128], strides = [1, 1]} : vector<64x128xf32> to vector<8x128xf32>
    %cst_27 = arith.constant dense<0.000000e+00> : vector<8x128xf32>
    %182 = tpu.matmul %160, %18, %cst_27 {dimension_numbers = #tpu.dot_dimension_numbers<[1], [0], [0], [1], [0, 0, 1, 1], [], []>} : vector<8x32xf32>, vector<32x128xf32>, vector<8x128xf32> -> vector<8x128xf32>
    %183 = arith.addf %181, %182 : vector<8x128xf32>
    %184 = vector.broadcast %8 : vector<1x128xf32> to vector<8x128xf32>
    %185 = arith.mulf %184, %183 : vector<8x128xf32>
    %186 = math.tanh %185 : vector<8x128xf32>
    %187 = vector.broadcast %8 : vector<1x128xf32> to vector<8x128xf32>
    %188 = arith.mulf %187, %186 : vector<8x128xf32>
    %189 = vector.broadcast %11 : vector<1x128xf32> to vector<8x128xf32>
    %190 = arith.addf %188, %189 : vector<8x128xf32>
    %191 = vector.extract_strided_slice %190 {offsets = [0, 0], sizes = [8, 32], strides = [1, 1]} : vector<8x128xf32> to vector<8x32xf32>
    %192 = vector.extract_strided_slice %190 {offsets = [0, 32], sizes = [8, 32], strides = [1, 1]} : vector<8x128xf32> to vector<8x32xf32>
    %193 = vector.extract_strided_slice %190 {offsets = [0, 64], sizes = [8, 32], strides = [1, 1]} : vector<8x128xf32> to vector<8x32xf32>
    %194 = vector.extract_strided_slice %190 {offsets = [0, 96], sizes = [8, 32], strides = [1, 1]} : vector<8x128xf32> to vector<8x32xf32>
    %195 = arith.mulf %192, %158 : vector<8x32xf32>
    %196 = arith.mulf %191, %193 : vector<8x32xf32>
    %197 = arith.addf %195, %196 : vector<8x32xf32>
    %198 = math.tanh %197 : vector<8x32xf32>
    %199 = arith.mulf %194, %198 : vector<8x32xf32>
    %200 = tpu.concatenate %199, %180 in 1 : vector<8x32xf32>, vector<8x32xf32> -> vector<8x64xf32>
    %cst_28 = arith.constant dense<0.000000e+00> : vector<8x128xf32>
    %201 = tpu.matmul %200, %19, %cst_28 {dimension_numbers = #tpu.dot_dimension_numbers<[1], [0], [0], [1], [0, 0, 1, 1], [], []>} : vector<8x64xf32>, vector<64x128xf32>, vector<8x128xf32> -> vector<8x128xf32>
    %202 = vector.broadcast %20 : vector<1x128xf32> to vector<8x128xf32>
    %203 = arith.addf %201, %202 : vector<8x128xf32>
    %204 = vector.broadcast %8 : vector<1x128xf32> to vector<8x128xf32>
    %205 = arith.mulf %204, %203 : vector<8x128xf32>
    %206 = math.tanh %205 : vector<8x128xf32>
    %207 = vector.broadcast %8 : vector<1x128xf32> to vector<8x128xf32>
    %208 = arith.mulf %207, %206 : vector<8x128xf32>
    %209 = vector.broadcast %11 : vector<1x128xf32> to vector<8x128xf32>
    %210 = arith.addf %208, %209 : vector<8x128xf32>
    %211 = vector.extract_strided_slice %210 {offsets = [0, 0], sizes = [8, 32], strides = [1, 1]} : vector<8x128xf32> to vector<8x32xf32>
    %212 = vector.extract_strided_slice %210 {offsets = [0, 32], sizes = [8, 32], strides = [1, 1]} : vector<8x128xf32> to vector<8x32xf32>
    %213 = vector.extract_strided_slice %210 {offsets = [0, 64], sizes = [8, 32], strides = [1, 1]} : vector<8x128xf32> to vector<8x32xf32>
    %214 = vector.extract_strided_slice %210 {offsets = [0, 96], sizes = [8, 32], strides = [1, 1]} : vector<8x128xf32> to vector<8x32xf32>
    %215 = arith.mulf %212, %178 : vector<8x32xf32>
    %216 = arith.mulf %211, %213 : vector<8x32xf32>
    %217 = arith.addf %215, %216 : vector<8x32xf32>
    %218 = math.tanh %217 : vector<8x32xf32>
    %219 = arith.mulf %214, %218 : vector<8x32xf32>
    %220 = vector.extract_strided_slice %17 {offsets = [40, 0], sizes = [8, 128], strides = [1, 1]} : vector<64x128xf32> to vector<8x128xf32>
    %cst_29 = arith.constant dense<0.000000e+00> : vector<8x128xf32>
    %221 = tpu.matmul %199, %18, %cst_29 {dimension_numbers = #tpu.dot_dimension_numbers<[1], [0], [0], [1], [0, 0, 1, 1], [], []>} : vector<8x32xf32>, vector<32x128xf32>, vector<8x128xf32> -> vector<8x128xf32>
    %222 = arith.addf %220, %221 : vector<8x128xf32>
    %223 = vector.broadcast %8 : vector<1x128xf32> to vector<8x128xf32>
    %224 = arith.mulf %223, %222 : vector<8x128xf32>
    %225 = math.tanh %224 : vector<8x128xf32>
    %226 = vector.broadcast %8 : vector<1x128xf32> to vector<8x128xf32>
    %227 = arith.mulf %226, %225 : vector<8x128xf32>
    %228 = vector.broadcast %11 : vector<1x128xf32> to vector<8x128xf32>
    %229 = arith.addf %227, %228 : vector<8x128xf32>
    %230 = vector.extract_strided_slice %229 {offsets = [0, 0], sizes = [8, 32], strides = [1, 1]} : vector<8x128xf32> to vector<8x32xf32>
    %231 = vector.extract_strided_slice %229 {offsets = [0, 32], sizes = [8, 32], strides = [1, 1]} : vector<8x128xf32> to vector<8x32xf32>
    %232 = vector.extract_strided_slice %229 {offsets = [0, 64], sizes = [8, 32], strides = [1, 1]} : vector<8x128xf32> to vector<8x32xf32>
    %233 = vector.extract_strided_slice %229 {offsets = [0, 96], sizes = [8, 32], strides = [1, 1]} : vector<8x128xf32> to vector<8x32xf32>
    %234 = arith.mulf %231, %197 : vector<8x32xf32>
    %235 = arith.mulf %230, %232 : vector<8x32xf32>
    %236 = arith.addf %234, %235 : vector<8x32xf32>
    %237 = math.tanh %236 : vector<8x32xf32>
    %238 = arith.mulf %233, %237 : vector<8x32xf32>
    %239 = tpu.concatenate %238, %219 in 1 : vector<8x32xf32>, vector<8x32xf32> -> vector<8x64xf32>
    %cst_30 = arith.constant dense<0.000000e+00> : vector<8x128xf32>
    %240 = tpu.matmul %239, %19, %cst_30 {dimension_numbers = #tpu.dot_dimension_numbers<[1], [0], [0], [1], [0, 0, 1, 1], [], []>} : vector<8x64xf32>, vector<64x128xf32>, vector<8x128xf32> -> vector<8x128xf32>
    %241 = vector.broadcast %20 : vector<1x128xf32> to vector<8x128xf32>
    %242 = arith.addf %240, %241 : vector<8x128xf32>
    %243 = vector.broadcast %8 : vector<1x128xf32> to vector<8x128xf32>
    %244 = arith.mulf %243, %242 : vector<8x128xf32>
    %245 = math.tanh %244 : vector<8x128xf32>
    %246 = vector.broadcast %8 : vector<1x128xf32> to vector<8x128xf32>
    %247 = arith.mulf %246, %245 : vector<8x128xf32>
    %248 = vector.broadcast %11 : vector<1x128xf32> to vector<8x128xf32>
    %249 = arith.addf %247, %248 : vector<8x128xf32>
    %250 = vector.extract_strided_slice %249 {offsets = [0, 0], sizes = [8, 32], strides = [1, 1]} : vector<8x128xf32> to vector<8x32xf32>
    %251 = vector.extract_strided_slice %249 {offsets = [0, 32], sizes = [8, 32], strides = [1, 1]} : vector<8x128xf32> to vector<8x32xf32>
    %252 = vector.extract_strided_slice %249 {offsets = [0, 64], sizes = [8, 32], strides = [1, 1]} : vector<8x128xf32> to vector<8x32xf32>
    %253 = vector.extract_strided_slice %249 {offsets = [0, 96], sizes = [8, 32], strides = [1, 1]} : vector<8x128xf32> to vector<8x32xf32>
    %254 = arith.mulf %251, %217 : vector<8x32xf32>
    %255 = arith.mulf %250, %252 : vector<8x32xf32>
    %256 = arith.addf %254, %255 : vector<8x32xf32>
    %257 = math.tanh %256 : vector<8x32xf32>
    %258 = arith.mulf %253, %257 : vector<8x32xf32>
    %259 = vector.extract_strided_slice %17 {offsets = [48, 0], sizes = [8, 128], strides = [1, 1]} : vector<64x128xf32> to vector<8x128xf32>
    %cst_31 = arith.constant dense<0.000000e+00> : vector<8x128xf32>
    %260 = tpu.matmul %238, %18, %cst_31 {dimension_numbers = #tpu.dot_dimension_numbers<[1], [0], [0], [1], [0, 0, 1, 1], [], []>} : vector<8x32xf32>, vector<32x128xf32>, vector<8x128xf32> -> vector<8x128xf32>
    %261 = arith.addf %259, %260 : vector<8x128xf32>
    %262 = vector.broadcast %8 : vector<1x128xf32> to vector<8x128xf32>
    %263 = arith.mulf %262, %261 : vector<8x128xf32>
    %264 = math.tanh %263 : vector<8x128xf32>
    %265 = vector.broadcast %8 : vector<1x128xf32> to vector<8x128xf32>
    %266 = arith.mulf %265, %264 : vector<8x128xf32>
    %267 = vector.broadcast %11 : vector<1x128xf32> to vector<8x128xf32>
    %268 = arith.addf %266, %267 : vector<8x128xf32>
    %269 = vector.extract_strided_slice %268 {offsets = [0, 0], sizes = [8, 32], strides = [1, 1]} : vector<8x128xf32> to vector<8x32xf32>
    %270 = vector.extract_strided_slice %268 {offsets = [0, 32], sizes = [8, 32], strides = [1, 1]} : vector<8x128xf32> to vector<8x32xf32>
    %271 = vector.extract_strided_slice %268 {offsets = [0, 64], sizes = [8, 32], strides = [1, 1]} : vector<8x128xf32> to vector<8x32xf32>
    %272 = vector.extract_strided_slice %268 {offsets = [0, 96], sizes = [8, 32], strides = [1, 1]} : vector<8x128xf32> to vector<8x32xf32>
    %273 = arith.mulf %270, %236 : vector<8x32xf32>
    %274 = arith.mulf %269, %271 : vector<8x32xf32>
    %275 = arith.addf %273, %274 : vector<8x32xf32>
    %276 = math.tanh %275 : vector<8x32xf32>
    %277 = arith.mulf %272, %276 : vector<8x32xf32>
    %278 = tpu.concatenate %277, %258 in 1 : vector<8x32xf32>, vector<8x32xf32> -> vector<8x64xf32>
    %cst_32 = arith.constant dense<0.000000e+00> : vector<8x128xf32>
    %279 = tpu.matmul %278, %19, %cst_32 {dimension_numbers = #tpu.dot_dimension_numbers<[1], [0], [0], [1], [0, 0, 1, 1], [], []>} : vector<8x64xf32>, vector<64x128xf32>, vector<8x128xf32> -> vector<8x128xf32>
    %280 = vector.broadcast %20 : vector<1x128xf32> to vector<8x128xf32>
    %281 = arith.addf %279, %280 : vector<8x128xf32>
    %282 = vector.broadcast %8 : vector<1x128xf32> to vector<8x128xf32>
    %283 = arith.mulf %282, %281 : vector<8x128xf32>
    %284 = math.tanh %283 : vector<8x128xf32>
    %285 = vector.broadcast %8 : vector<1x128xf32> to vector<8x128xf32>
    %286 = arith.mulf %285, %284 : vector<8x128xf32>
    %287 = vector.broadcast %11 : vector<1x128xf32> to vector<8x128xf32>
    %288 = arith.addf %286, %287 : vector<8x128xf32>
    %289 = vector.extract_strided_slice %288 {offsets = [0, 0], sizes = [8, 32], strides = [1, 1]} : vector<8x128xf32> to vector<8x32xf32>
    %290 = vector.extract_strided_slice %288 {offsets = [0, 32], sizes = [8, 32], strides = [1, 1]} : vector<8x128xf32> to vector<8x32xf32>
    %291 = vector.extract_strided_slice %288 {offsets = [0, 64], sizes = [8, 32], strides = [1, 1]} : vector<8x128xf32> to vector<8x32xf32>
    %292 = vector.extract_strided_slice %288 {offsets = [0, 96], sizes = [8, 32], strides = [1, 1]} : vector<8x128xf32> to vector<8x32xf32>
    %293 = arith.mulf %290, %256 : vector<8x32xf32>
    %294 = arith.mulf %289, %291 : vector<8x32xf32>
    %295 = arith.addf %293, %294 : vector<8x32xf32>
    %296 = math.tanh %295 : vector<8x32xf32>
    %297 = arith.mulf %292, %296 : vector<8x32xf32>
    %298 = vector.extract_strided_slice %17 {offsets = [56, 0], sizes = [8, 128], strides = [1, 1]} : vector<64x128xf32> to vector<8x128xf32>
    %cst_33 = arith.constant dense<0.000000e+00> : vector<8x128xf32>
    %299 = tpu.matmul %277, %18, %cst_33 {dimension_numbers = #tpu.dot_dimension_numbers<[1], [0], [0], [1], [0, 0, 1, 1], [], []>} : vector<8x32xf32>, vector<32x128xf32>, vector<8x128xf32> -> vector<8x128xf32>
    %300 = arith.addf %298, %299 : vector<8x128xf32>
    %301 = vector.broadcast %8 : vector<1x128xf32> to vector<8x128xf32>
    %302 = arith.mulf %301, %300 : vector<8x128xf32>
    %303 = math.tanh %302 : vector<8x128xf32>
    %304 = vector.broadcast %8 : vector<1x128xf32> to vector<8x128xf32>
    %305 = arith.mulf %304, %303 : vector<8x128xf32>
    %306 = vector.broadcast %11 : vector<1x128xf32> to vector<8x128xf32>
    %307 = arith.addf %305, %306 : vector<8x128xf32>
    %308 = vector.extract_strided_slice %307 {offsets = [0, 0], sizes = [8, 32], strides = [1, 1]} : vector<8x128xf32> to vector<8x32xf32>
    %309 = vector.extract_strided_slice %307 {offsets = [0, 32], sizes = [8, 32], strides = [1, 1]} : vector<8x128xf32> to vector<8x32xf32>
    %310 = vector.extract_strided_slice %307 {offsets = [0, 64], sizes = [8, 32], strides = [1, 1]} : vector<8x128xf32> to vector<8x32xf32>
    %311 = vector.extract_strided_slice %307 {offsets = [0, 96], sizes = [8, 32], strides = [1, 1]} : vector<8x128xf32> to vector<8x32xf32>
    %312 = arith.mulf %309, %275 : vector<8x32xf32>
    %313 = arith.mulf %308, %310 : vector<8x32xf32>
    %314 = arith.addf %312, %313 : vector<8x32xf32>
    %315 = math.tanh %314 : vector<8x32xf32>
    %316 = arith.mulf %311, %315 : vector<8x32xf32>
    %317 = tpu.concatenate %316, %297 in 1 : vector<8x32xf32>, vector<8x32xf32> -> vector<8x64xf32>
    %cst_34 = arith.constant dense<0.000000e+00> : vector<8x128xf32>
    %318 = tpu.matmul %317, %19, %cst_34 {dimension_numbers = #tpu.dot_dimension_numbers<[1], [0], [0], [1], [0, 0, 1, 1], [], []>} : vector<8x64xf32>, vector<64x128xf32>, vector<8x128xf32> -> vector<8x128xf32>
    %319 = vector.broadcast %20 : vector<1x128xf32> to vector<8x128xf32>
    %320 = arith.addf %318, %319 : vector<8x128xf32>
    %321 = vector.broadcast %8 : vector<1x128xf32> to vector<8x128xf32>
    %322 = arith.mulf %321, %320 : vector<8x128xf32>
    %323 = math.tanh %322 : vector<8x128xf32>
    %324 = vector.broadcast %8 : vector<1x128xf32> to vector<8x128xf32>
    %325 = arith.mulf %324, %323 : vector<8x128xf32>
    %326 = vector.broadcast %11 : vector<1x128xf32> to vector<8x128xf32>
    %327 = arith.addf %325, %326 : vector<8x128xf32>
    %328 = vector.extract_strided_slice %327 {offsets = [0, 0], sizes = [8, 32], strides = [1, 1]} : vector<8x128xf32> to vector<8x32xf32>
    %329 = vector.extract_strided_slice %327 {offsets = [0, 32], sizes = [8, 32], strides = [1, 1]} : vector<8x128xf32> to vector<8x32xf32>
    %330 = vector.extract_strided_slice %327 {offsets = [0, 64], sizes = [8, 32], strides = [1, 1]} : vector<8x128xf32> to vector<8x32xf32>
    %331 = vector.extract_strided_slice %327 {offsets = [0, 96], sizes = [8, 32], strides = [1, 1]} : vector<8x128xf32> to vector<8x32xf32>
    %332 = arith.mulf %329, %295 : vector<8x32xf32>
    %333 = arith.mulf %328, %330 : vector<8x32xf32>
    %334 = arith.addf %332, %333 : vector<8x32xf32>
    %335 = math.tanh %334 : vector<8x32xf32>
    %336 = arith.mulf %331, %335 : vector<8x32xf32>
    %c0_35 = arith.constant 0 : index
    %c0_36 = arith.constant 0 : index
    %337 = vector.load %arg6[%c0_35, %c0_36] : memref<1x32xf32, #tpu.memory_space<vmem>>, vector<1x32xf32>
    %338 = vector.broadcast %337 : vector<1x32xf32> to vector<8x32xf32>
    %339 = arith.mulf %336, %338 : vector<8x32xf32>
    %cst_37 = arith.constant dense<0.000000e+00> : vector<8xf32>
    %340 = vector.multi_reduction <add>, %339, %cst_37 [1] : vector<8x32xf32> to vector<8xf32>
    %341 = vector.shape_cast %340 : vector<8xf32> to vector<8x1xf32>
    %c0_38 = arith.constant 0 : index
    %c0_39 = arith.constant 0 : index
    %342 = vector.load %arg7[%c0_38, %c0_39] : memref<1x1xf32, #tpu.memory_space<vmem>>, vector<1x1xf32>
    %343 = vector.broadcast %342 : vector<1x1xf32> to vector<8x1xf32>
    %344 = arith.addf %341, %343 : vector<8x1xf32>
    %345 = arith.negf %344 : vector<8x1xf32>
    %346 = math.exp %345 : vector<8x1xf32>
    %cst_40 = arith.constant 1.000000e+00 : f32
    %347 = vector.broadcast %cst_40 : f32 to vector<8x1xf32>
    %348 = arith.addf %347, %346 : vector<8x1xf32>
    %349 = arith.divf %347, %348 : vector<8x1xf32>
    %c0_41 = arith.constant 0 : index
    %c0_42 = arith.constant 0 : index
    %350 = vector.load %arg8[%c0_41, %c0_42] : memref<8x1xf32, #tpu.memory_space<vmem>>, vector<8x1xf32>
    tpu.vector_store %arg8[%c0_41, %c0_42], %349 {strides = array<i32>} : memref<8x1xf32, #tpu.memory_space<vmem>>, vector<8x1xf32>,
    return
  }
}

</mosaic_0001>

<bundles_post_ra>
// kernel: tpu_custom_call.1
= control target key start
LH: loop header
LB: loop body
LE: loop exit
PB: predicated region body
PF: predicated region fallthrough
CT: control target
= control target key end

     0   :  { %s1522_s0 = inlined_call_operand.vmem [shape: f32[64,16], index: 0, kind: input, shape index: {}]   ;;  %s1523_s1 = inlined_call_operand.vmem [shape: f32[16,128], index: 1, kind: input, shape index: {}]   ;;  %s1524_s2 = inlined_call_operand.hbm [shape: f32[32,128], index: 2, kind: input, shape index: {}]   ;;  %s1525_s3 = inlined_call_operand.vmem [shape: f32[1,128], index: 3, kind: input, shape index: {}]   ;;  %s1526_s4 = inlined_call_operand.vmem [shape: f32[64,128], index: 4, kind: input, shape index: {}]   ;;  %s1527_s5 = inlined_call_operand.vmem [shape: f32[1,128], index: 5, kind: input, shape index: {}]   ;;  %s1528_s6 = inlined_call_operand.vmem [shape: f32[1,32], index: 6, kind: input, shape index: {}]   ;;  %s1529_s7 = inlined_call_operand.<no memory space> [shape: f32[1,1], index: 7, kind: input, shape index: {}]   ;;  %s1530_s8 = inlined_call_operand.vmem [shape: f32[8,1], index: 8, kind: output, shape index: {}]  }
   0x1   :  { %v13_v0 = vstv %s1529_s7 }
   0x2   :  { %14 = vst [vmem:[#allocation2] sm:$0x1] %v13_v0 }
   0x3   :  { %15 = vsyncpa [#allocation4], 0  ;;  %s24_s9 = sshll.u32 %s1524_s2, 4  ;;  %s1102_s10 = smov [#allocation3]   ;;  %s25_s9 = int_to_ptr.hbm [resolvable:$true] %s24_s9 }
   0x4   :  { %s26_s11 = sshll.u32 %s1102_s10, 4  ;;  %s1103_s12 = smov 128   ;;  %s27_s11 = int_to_ptr.vmem [resolvable:$true] %s26_s11 }
   0x5   :  { %s1104_s13 = smov 8  }
   0x6   :  { %32 = dma.hbm_to_vmem [thread:$0]  %s25_s9, 512, %s27_s11, [#allocation4], %s1103_s12, %s1103_s12, %s1104_s13  }
   0x7   :  { %1100 = dma.done.wait [#allocation4], 512  }
   0x8   :  { %1101 = vsyncadd [#allocation4], 4294966784  ;;  %v63_v1 = vld [vmem:[%s1523_s1 + $0x8] sm:$0xff]  ;;  %v62_v2 = vld [vmem:[%s1523_s1] sm:$0xff]  ;;  %vm68_vm0 = vcmask 130048   ;;  %v1105_v9 = vmov 0.0   ;;  %v47_v10 = vlaneseq }
   0x9   :  { %994 = vmatpush.msra.mxu1 %v63_v1  ;;  %v61_v3 = vld [vmem:[%s1522_s0 + $0x38] sm:$0xff]  ;;  %107 = vmatpush.msra.mxu0 %v63_v1  ;;  %v54_v5 = vld [vmem:[%s1522_s0] sm:$0xff]  ;;  %v1182_v7 = vld [vmem:[#allocation3 + $0x8] sm:$0xff]  ;;  %v1106_v16 = vmov 0.5   ;;  %s1108_s21 = smov 32   ;;  %vm147_vm4 = vcmask 261120  }
   0xa   :  { %v1170_v4 = vld [vmem:[#allocation3 + $0x18] sm:$0xff]  ;;  %v1177_v6 = vld [vmem:[#allocation3 + $0x10] sm:$0xff]  ;;  %v1186_v8 = vld [vmem:[#allocation3] sm:$0xff]  ;;  %v48_v11 = vand.u32 127, %v47_v10  ;;  %vm201_vm5 = vcmask 523264   ;;  %s1109_s27 = smov 96  }
   0xb   :  { %260 = vmatpush.msra.mxu3 %v1170_v4  ;;  %995 = vmatpush.msra.mxu1 %v62_v2  ;;  %v1200_v14 = vld [vmem:[%s1525_s3] ss:$0 sm:$0xff]  ;;  %s1107_s3 = smov 64   ;;  %v1219_v31 = vld [vmem:[%s1526_s4 + $0x38] sm:$0xff]  ;;  %v1224_v32 = vld [vmem:[%s1526_s4 + $0x30] sm:$0xff]  ;;  %vm963_vm8 = vcmask 7168  }
   0xc   :  { %108 = vmatpush.msra.mxu0 %v62_v2  ;;  %977 = vmatmul.msk.f32.vlgmr.msra.gmra.mxu1 %vm68_vm0, %v61_v3  ;;  %vm49_vm1 = vcmp.ge.s32.totalorder %v48_v11, 64  ;;  %vm50_vm2 = vcmp.lt.s32.totalorder %v48_v11, 96  ;;  %v1231_v33 = vld [vmem:[%s1526_s4 + $0x28] sm:$0xff]  ;;  %v1239_v34 = vld [vmem:[%s1526_s4 + $0x20] sm:$0xff]  ;;  %v1247_v35 = vld [vmem:[%s1526_s4 + $0x18] sm:$0xff] }
   0xd   :  { %970 = vmatmul.msk.f32.vlgmr.msra.gmra.mxu0 %vm68_vm0, %v54_v5  ;;  %163 = vmatpush.msrb.mxu1 %v1170_v4  ;;  %vm51_vm3 = vmand %vm49_vm1, %vm50_vm2  ;;  %v1255_v36 = vld [vmem:[%s1526_s4 + $0x10] sm:$0xff]  ;;  %v1263_v37 = vld [vmem:[%s1526_s4 + $0x8] sm:$0xff] }
   0xe   :  { %261 = vmatpush.msra.mxu3 %v1177_v6  ;;  %v1203_v17 = vsel %vm51_vm3, 1.0, %v1106_v16  ;;  %v1206_v22 = vsel %vm51_vm3, 0.0, %v1106_v16  ;;  %213 = vmatpush.msra.mxu2 %v1219_v31  ;;  %v1276_v40 = vld [vmem:[%s1526_s4] sm:$0xff]  ;;  %v55_v41 = vld [vmem:[%s1522_s0 + $0x8] sm:$0xff] }
   0xf   :  { %164 = vmatpush.msrb.mxu1 %v1177_v6  ;;  %892 = vmatpush.msrb.mxu0 %v1219_v31  ;;  %v1320_v46 = vld [vmem:[%s1527_s5] ss:$0 sm:$0xff] }
  0x10   :  { %262 = vmatpush.msra.mxu3 %v1182_v7  ;;  %214 = vmatpush.msra.mxu2 %v1224_v32 }
  0x11   :  { %165 = vmatpush.msrb.mxu1 %v1182_v7  ;;  %893 = vmatpush.msrb.mxu0 %v1224_v32 }
  0x12   :  { %263 = vmatpush.msra.mxu3 %v1186_v8  ;;  %215 = vmatpush.msra.mxu2 %v1231_v33 }
  0x13   :  { %166 = vmatpush.msrb.mxu1 %v1186_v8  ;;  %894 = vmatpush.msrb.mxu0 %v1231_v33 }
  0x14   :  { %357 = vmatpush.msrb.mxu3 %v1170_v4  ;;  %167 = vmatmul.f32.vlgmr.msrb.gmra.mxu1 %v1105_v9 }
  0x15   :  { %310 = vmatpush.msra.mxu1 %v1219_v31  ;;  %216 = vmatpush.msra.mxu2 %v1239_v34 }
  0x16   :  { %358 = vmatpush.msrb.mxu3 %v1177_v6  ;;  %895 = vmatpush.msrb.mxu0 %v1239_v34 }
  0x17   :  { %311 = vmatpush.msra.mxu1 %v1224_v32  ;;  %217 = vmatpush.msra.mxu2 %v1247_v35 }
  0x18   :  { %359 = vmatpush.msrb.mxu3 %v1182_v7  ;;  %896 = vmatpush.msrb.mxu0 %v1247_v35 }
  0x19   :  { %312 = vmatpush.msra.mxu1 %v1231_v33  ;;  %218 = vmatpush.msra.mxu2 %v1255_v36 }
  0x1a   :  { %360 = vmatpush.msrb.mxu3 %v1186_v8  ;;  %897 = vmatpush.msrb.mxu0 %v1255_v36 }
  0x1b   :  { %313 = vmatpush.msra.mxu1 %v1239_v34  ;;  %219 = vmatpush.msra.mxu2 %v1263_v37 }
  0x1c   :  { %898 = vmatpush.msrb.mxu0 %v1263_v37 }
  0x1d   :  { %314 = vmatpush.msra.mxu1 %v1247_v35  ;;  %220 = vmatpush.msra.mxu2 %v1276_v40 }
  0x1e   :  { %971 = vmatmul.msk.f32.gmra.mxu0 %vm68_vm0, %v55_v41 }
  0x1f   :  { %315 = vmatpush.msra.mxu1 %v1255_v36  ;;  %407 = vmatpush.msrb.mxu2 %v1219_v31 }
  0x20   :  { %899 = vmatpush.msrb.mxu0 %v1276_v40 }
  0x21   :  { %316 = vmatpush.msra.mxu1 %v1263_v37  ;;  %408 = vmatpush.msrb.mxu2 %v1224_v32 }
  0x23   :  { %317 = vmatpush.msra.mxu1 %v1276_v40  ;;  %409 = vmatpush.msrb.mxu2 %v1231_v33 }
  0x25   :  { %504 = vmatpush.msrb.mxu1 %v1219_v31  ;;  %410 = vmatpush.msrb.mxu2 %v1239_v34 }
  0x27   :  { %505 = vmatpush.msrb.mxu1 %v1224_v32  ;;  %411 = vmatpush.msrb.mxu2 %v1247_v35 }
  0x29   :  { %506 = vmatpush.msrb.mxu1 %v1231_v33  ;;  %412 = vmatpush.msrb.mxu2 %v1255_v36 }
  0x2b   :  { %507 = vmatpush.msrb.mxu1 %v1239_v34  ;;  %413 = vmatpush.msrb.mxu2 %v1263_v37 }
  0x2d   :  { %508 = vmatpush.msrb.mxu1 %v1247_v35  ;;  %414 = vmatpush.msrb.mxu2 %v1276_v40 }
  0x2f   :  { %509 = vmatpush.msrb.mxu1 %v1255_v36 }
  0x31   :  { %510 = vmatpush.msrb.mxu1 %v1263_v37 }
  0x33   :  { %511 = vmatpush.msrb.mxu1 %v1276_v40 }
  0x89   :  { %v1195_v12 = vpop.f32.mrf.mxu1 }
  0x8a   :  { %v110_v13 = vpop.f32.mrf.mxu0 }
  0x8b   :  { %v111_v15 = vadd.f32 %v1200_v14, %v110_v13 }
  0x91   :  { %v168_v18 = vpop.f32.mrf.mxu1 }
  0x92   :  { %v171_v19 = vadd.f32 %v168_v18, %v111_v15  ;;  %v56_v18 = vld [vmem:[%s1522_s0 + $0x10] sm:$0xff] }
  0x93   :  { %972 = vmatmul.msk.f32.gmra.mxu0 %vm68_vm0, %v56_v18 }
  0x94   :  { %v172_v20 = vmul.f32 %v171_v19, %v1203_v17 }
  0x96   :  { %1008 = vtanh.f32 %v172_v20 }
  0x9b   :  { %v113_v44 = vpop.f32.mrf.mxu0 }
  0x9c   :  { %v1009_v21 = vpop.eup %1008  ;;  %v114_v45 = vadd.f32 %v1200_v14, %v113_v44 }
  0x9d   :  { %v174_v23 = vmul.f32 %v1009_v21, %v1203_v17 }
  0x9f   :  { %v175_v24 = vadd.f32 %v174_v23, %v1206_v22 }
  0xa1   :  { %178 = vrot.lane.b32.xlu0 %v175_v24, %s1107_s3  ;;  %v176_v27 = vmul.f32 0.0, %v175_v24 }
 0x110   :  { %v116_v23 = vpop.f32.mrf.mxu0 }
 0x113   :  { %v179_v25 = vpop.permute.xlu0 %178 }
 0x114   :  { %v181_v26 = vmul.f32 %v179_v25, %v175_v24 }
 0x116   :  { %183 = vrot.lane.b32.xlu0 %v181_v26, %s1108_s21 }
 0x188   :  { %v184_v28 = vpop.permute.xlu0 %183 }
 0x189   :  { %v1212_v29 = vadd.f32 %v184_v28, %v176_v27 }
 0x18b   :  { %1010 = vtanh.f32 %v1212_v29 }
 0x191   :  { %v1011_v30 = vpop.eup %1010 }
 0x192   :  { %189 = vrot.lane.b32.xlu1 %v1011_v30, %s1107_s3 }
 0x204   :  { %v190_v38 = vpop.permute.xlu1 %189 }
 0x205   :  { %v192_v39 = vmul.f32 %v190_v38, %v175_v24  ;;  %v117_v24 = vadd.f32 %v1200_v14, %v116_v23 }
 0x207   :  { %194 = vrot.lane.b32.xlu1 %v192_v39, %s1108_s21 }
 0x279   :  { %v195_v42 = vpop.permute.xlu1 %194 }
 0x27a   :  { %979 = vmatmul.msk.f32.vlgmr.msra.gmra.mxu3 %vm147_vm4, %v195_v42  ;;  %v197_v43 = vsel %vm147_vm4, %v195_v42, 0.0 }
 0x27b   :  { %978 = vmatmul.msk.f32.vlgmr.msra.gmra.mxu2 %vm201_vm5, %v197_v43  ;;  %454 = vmatpush.msra.mxu3 %v1170_v4 }
 0x27c   :  { %601 = vmatpush.msra.mxu2 %v1219_v31 }
 0x27d   :  { %455 = vmatpush.msra.mxu3 %v1177_v6 }
 0x27e   :  { %602 = vmatpush.msra.mxu2 %v1224_v32 }
 0x27f   :  { %456 = vmatpush.msra.mxu3 %v1182_v7 }
 0x280   :  { %603 = vmatpush.msra.mxu2 %v1231_v33 }
 0x281   :  { %457 = vmatpush.msra.mxu3 %v1186_v8 }
 0x282   :  { %604 = vmatpush.msra.mxu2 %v1239_v34 }
 0x284   :  { %605 = vmatpush.msra.mxu2 %v1247_v35 }
 0x286   :  { %606 = vmatpush.msra.mxu2 %v1255_v36 }
 0x288   :  { %607 = vmatpush.msra.mxu2 %v1263_v37 }
 0x28a   :  { %608 = vmatpush.msra.mxu2 %v1276_v40 }
 0x2fd   :  { %v265_v47 = vpop.f32.mrf.mxu3 }
 0x2fe   :  { %v268_v48 = vadd.f32 %v265_v47, %v114_v45  ;;  %v222_v49 = vpop.f32.mrf.mxu2 }
 0x2ff   :  { %v223_v50 = vadd.f32 %v1320_v46, %v222_v49 }
 0x300   :  { %v269_v51 = vmul.f32 %v268_v48, %v1203_v17 }
 0x301   :  { %v225_v52 = vmul.f32 %v223_v50, %v1203_v17 }
 0x302   :  { %1012 = vtanh.f32 %v269_v51 }
 0x303   :  { %1014 = vtanh.f32 %v225_v52 }
 0x308   :  { %v1013_v53 = vpop.eup %1012 }
 0x309   :  { %v271_v54 = vmul.f32 %v1013_v53, %v1203_v17  ;;  %v1015_v56 = vpop.eup %1014 }
 0x30a   :  { %v227_v57 = vmul.f32 %v1015_v56, %v1203_v17 }
 0x30b   :  { %v272_v55 = vadd.f32 %v271_v54, %v1206_v22 }
 0x30c   :  { %v228_v58 = vadd.f32 %v227_v57, %v1206_v22 }
 0x30d   :  { %275 = vrot.lane.b32.xlu2 %v272_v55, %s1107_s3  ;;  %v273_v63 = vmul.f32 %v272_v55, %v1212_v29 }
 0x30e   :  { %v229_v2 = vmul.f32 0.0, %v228_v58 }
 0x315   :  { %231 = vrot.lane.b32.xlu2 %v228_v58, %s1107_s3 }
 0x367   :  { %v276_v59 = vpop.permute.xlu2 %275 }
 0x368   :  { %v278_v60 = vmul.f32 %v276_v59, %v272_v55 }
 0x36a   :  { %280 = vrot.lane.b32.xlu0 %v278_v60, %s1108_s21 }
 0x36f   :  { %v232_v61 = vpop.permute.xlu2 %231 }
 0x370   :  { %v234_v62 = vmul.f32 %v232_v61, %v228_v58 }
 0x372   :  { %236 = vrot.lane.b32.xlu1 %v234_v62, %s1108_s21  ;;  %v57_v62 = vld [vmem:[%s1522_s0 + $0x18] sm:$0xff] }
 0x373   :  { %973 = vmatmul.msk.f32.gmra.mxu0 %vm68_vm0, %v57_v62 }
 0x3dc   :  { %v281_v0 = vpop.permute.xlu0 %280 }
 0x3dd   :  { %v283_v1 = vadd.f32 %v281_v0, %v273_v63 }
 0x3df   :  { %1016 = vtanh.f32 %v283_v1 }
 0x3e4   :  { %v237_v3 = vpop.permute.xlu1 %236 }
 0x3e5   :  { %v1017_v5 = vpop.eup %1016  ;;  %v239_v9 = vadd.f32 %v237_v3, %v229_v2 }
 0x3e6   :  { %286 = vrot.lane.b32.xlu2 %v1017_v5, %s1107_s3 }
 0x3e7   :  { %1018 = vtanh.f32 %v239_v9 }
 0x3ed   :  { %v1019_v10 = vpop.eup %1018 }
 0x3ee   :  { %242 = vrot.lane.b32.xlu0 %v1019_v10, %s1107_s3 }
 0x3f0   :  { %v119_v2 = vpop.f32.mrf.mxu0 }
 0x3f1   :  { %v120_v3 = vadd.f32 %v1200_v14, %v119_v2 }
 0x440   :  { %v287_v11 = vpop.permute.xlu2 %286 }
 0x441   :  { %v289_v13 = vmul.f32 %v287_v11, %v272_v55 }
 0x443   :  { %291 = vrot.lane.b32.xlu1 %v289_v13, %s1108_s21 }
 0x460   :  { %v243_v15 = vpop.permute.xlu0 %242 }
 0x461   :  { %v245_v16 = vmul.f32 %v243_v15, %v228_v58 }
 0x463   :  { %295 = vrot.lane.b32.xlu2 %v245_v16, %s1107_s3 }
 0x4b5   :  { %v292_v19 = vpop.permute.xlu1 %291 }
 0x4b6   :  { %981 = vmatmul.msk.f32.vlgmr.msrb.gmra.mxu3 %vm147_vm4, %v292_v19 }
 0x4b7   :  { %551 = vmatpush.msrb.mxu3 %v1170_v4 }
 0x4b9   :  { %552 = vmatpush.msrb.mxu3 %v1177_v6 }
 0x4bb   :  { %553 = vmatpush.msrb.mxu3 %v1182_v7 }
 0x4bd   :  { %v296_v20 = vpop.permute.xlu2 %295  ;;  %554 = vmatpush.msrb.mxu3 %v1186_v8 }
 0x4be   :  { %v298_v21 = vsel %vm147_vm4, %v292_v19, %v296_v20 }
 0x4bf   :  { %980 = vmatmul.msk.f32.vlgmr.msra.gmra.mxu1 %vm201_vm5, %v298_v21 }
 0x4c0   :  { %698 = vmatpush.msra.mxu1 %v1219_v31 }
 0x4c2   :  { %699 = vmatpush.msra.mxu1 %v1224_v32 }
 0x4c4   :  { %700 = vmatpush.msra.mxu1 %v1231_v33 }
 0x4c6   :  { %701 = vmatpush.msra.mxu1 %v1239_v34 }
 0x4c8   :  { %702 = vmatpush.msra.mxu1 %v1247_v35 }
 0x4ca   :  { %703 = vmatpush.msra.mxu1 %v1255_v36 }
 0x4cc   :  { %704 = vmatpush.msra.mxu1 %v1263_v37 }
 0x4ce   :  { %705 = vmatpush.msra.mxu1 %v1276_v40 }
 0x539   :  { %v362_v25 = vpop.f32.mrf.mxu3 }
 0x53a   :  { %v365_v26 = vadd.f32 %v362_v25, %v117_v24 }
 0x53c   :  { %v366_v27 = vmul.f32 %v365_v26, %v1203_v17  ;;  %v319_v28 = vpop.f32.mrf.mxu1 }
 0x53d   :  { %v320_v29 = vadd.f32 %v1320_v46, %v319_v28 }
 0x53e   :  { %1020 = vtanh.f32 %v366_v27 }
 0x53f   :  { %v322_v30 = vmul.f32 %v320_v29, %v1203_v17 }
 0x541   :  { %1022 = vtanh.f32 %v322_v30 }
 0x544   :  { %v1021_v38 = vpop.eup %1020 }
 0x545   :  { %v368_v39 = vmul.f32 %v1021_v38, %v1203_v17 }
 0x547   :  { %v1023_v41 = vpop.eup %1022  ;;  %v369_v42 = vadd.f32 %v368_v39, %v1206_v22  ;;  %v58_v39 = vld [vmem:[%s1522_s0 + $0x20] sm:$0xff] }
 0x548   :  { %v324_v43 = vmul.f32 %v1023_v41, %v1203_v17  ;;  %974 = vmatmul.msk.f32.gmra.mxu0 %vm68_vm0, %v58_v39 }
 0x549   :  { %372 = vrot.lane.b32.xlu0 %v369_v42, %s1107_s3  ;;  %v370_v50 = vmul.f32 %v369_v42, %v283_v1 }
 0x54a   :  { %v325_v44 = vadd.f32 %v324_v43, %v1206_v22 }
 0x54c   :  { %328 = vrot.lane.b32.xlu1 %v325_v44, %s1107_s3  ;;  %v326_v54 = vmul.f32 %v325_v44, %v239_v9 }
 0x5bb   :  { %v373_v45 = vpop.permute.xlu0 %372 }
 0x5bc   :  { %v375_v47 = vmul.f32 %v373_v45, %v369_v42 }
 0x5be   :  { %v329_v48 = vpop.permute.xlu1 %328  ;;  %377 = vrot.lane.b32.xlu2 %v375_v47, %s1108_s21 }
 0x5bf   :  { %v331_v49 = vmul.f32 %v329_v48, %v325_v44 }
 0x5c1   :  { %333 = vrot.lane.b32.xlu0 %v331_v49, %s1108_s21 }
 0x618   :  { %v378_v51 = vpop.permute.xlu2 %377 }
 0x619   :  { %v380_v52 = vadd.f32 %v378_v51, %v370_v50 }
 0x61b   :  { %1024 = vtanh.f32 %v380_v52 }
 0x621   :  { %v1025_v53 = vpop.eup %1024 }
 0x622   :  { %383 = vrot.lane.b32.xlu1 %v1025_v53, %s1107_s3 }
 0x633   :  { %v334_v55 = vpop.permute.xlu0 %333 }
 0x634   :  { %v336_v56 = vadd.f32 %v334_v55, %v326_v54 }
 0x636   :  { %1026 = vtanh.f32 %v336_v56 }
 0x63c   :  { %v1027_v57 = vpop.eup %1026 }
 0x63d   :  { %339 = vrot.lane.b32.xlu2 %v1027_v57, %s1107_s3 }
 0x694   :  { %v384_v58 = vpop.permute.xlu1 %383 }
 0x695   :  { %v386_v59 = vmul.f32 %v384_v58, %v369_v42 }
 0x697   :  { %388 = vrot.lane.b32.xlu0 %v386_v59, %s1108_s21  ;;  %v340_v60 = vpop.permute.xlu2 %339 }
 0x698   :  { %v342_v61 = vmul.f32 %v340_v60, %v325_v44  ;;  %v122_v44 = vpop.f32.mrf.mxu0 }
 0x699   :  { %v123_v45 = vadd.f32 %v1200_v14, %v122_v44 }
 0x69a   :  { %392 = vrot.lane.b32.xlu1 %v342_v61, %s1107_s3 }
 0x709   :  { %v389_v63 = vpop.permute.xlu0 %388 }
 0x70a   :  { %983 = vmatmul.msk.f32.vlgmr.msra.gmra.mxu3 %vm147_vm4, %v389_v63 }
 0x70b   :  { %648 = vmatpush.msra.mxu3 %v1170_v4 }
 0x70c   :  { %v393_v0 = vpop.permute.xlu1 %392 }
 0x70d   :  { %v395_v1 = vsel %vm147_vm4, %v389_v63, %v393_v0  ;;  %649 = vmatpush.msra.mxu3 %v1177_v6 }
 0x70e   :  { %982 = vmatmul.msk.f32.vlgmr.msrb.gmra.mxu2 %vm201_vm5, %v395_v1 }
 0x70f   :  { %650 = vmatpush.msra.mxu3 %v1182_v7  ;;  %795 = vmatpush.msrb.mxu2 %v1219_v31 }
 0x711   :  { %651 = vmatpush.msra.mxu3 %v1186_v8  ;;  %796 = vmatpush.msrb.mxu2 %v1224_v32 }
 0x713   :  { %797 = vmatpush.msrb.mxu2 %v1231_v33 }
 0x715   :  { %798 = vmatpush.msrb.mxu2 %v1239_v34 }
 0x717   :  { %799 = vmatpush.msrb.mxu2 %v1247_v35 }
 0x719   :  { %800 = vmatpush.msrb.mxu2 %v1255_v36 }
 0x71b   :  { %801 = vmatpush.msrb.mxu2 %v1263_v37 }
 0x71d   :  { %802 = vmatpush.msrb.mxu2 %v1276_v40 }
 0x78d   :  { %v459_v31 = vpop.f32.mrf.mxu3 }
 0x78e   :  { %v462_v5 = vadd.f32 %v459_v31, %v120_v3 }
 0x790   :  { %v463_v9 = vmul.f32 %v462_v5, %v1203_v17 }
 0x791   :  { %v416_v32 = vpop.f32.mrf.mxu2 }
 0x792   :  { %1028 = vtanh.f32 %v463_v9  ;;  %v417_v33 = vadd.f32 %v1320_v46, %v416_v32 }
 0x794   :  { %v419_v34 = vmul.f32 %v417_v33, %v1203_v17 }
 0x796   :  { %1030 = vtanh.f32 %v419_v34 }
 0x798   :  { %v1029_v35 = vpop.eup %1028 }
 0x799   :  { %v465_v36 = vmul.f32 %v1029_v35, %v1203_v17 }
 0x79b   :  { %v466_v37 = vadd.f32 %v465_v36, %v1206_v22  ;;  %v59_v36 = vld [vmem:[%s1522_s0 + $0x28] sm:$0xff] }
 0x79c   :  { %v1031_v40 = vpop.eup %1030  ;;  %975 = vmatmul.msk.f32.gmra.mxu0 %vm68_vm0, %v59_v36 }
 0x79d   :  { %469 = vrot.lane.b32.xlu2 %v466_v37, %s1107_s3  ;;  %v421_v10 = vmul.f32 %v1031_v40, %v1203_v17  ;;  %v467_v19 = vmul.f32 %v466_v37, %v380_v52 }
 0x79f   :  { %v422_v11 = vadd.f32 %v421_v10, %v1206_v22 }
 0x7a1   :  { %425 = vrot.lane.b32.xlu0 %v422_v11, %s1107_s3  ;;  %v423_v23 = vmul.f32 %v422_v11, %v336_v56 }
 0x7f7   :  { %v470_v13 = vpop.permute.xlu2 %469 }
 0x7f8   :  { %v472_v15 = vmul.f32 %v470_v13, %v466_v37 }
 0x7fa   :  { %474 = vrot.lane.b32.xlu1 %v472_v15, %s1108_s21 }
 0x813   :  { %v426_v16 = vpop.permute.xlu0 %425 }
 0x814   :  { %v428_v18 = vmul.f32 %v426_v16, %v422_v11 }
 0x816   :  { %430 = vrot.lane.b32.xlu2 %v428_v18, %s1108_s21 }
 0x86c   :  { %v475_v20 = vpop.permute.xlu1 %474 }
 0x86d   :  { %v477_v21 = vadd.f32 %v475_v20, %v467_v19 }
 0x86f   :  { %1032 = vtanh.f32 %v477_v21 }
 0x870   :  { %v431_v24 = vpop.permute.xlu2 %430 }
 0x871   :  { %v433_v25 = vadd.f32 %v431_v24, %v423_v23 }
 0x873   :  { %1034 = vtanh.f32 %v433_v25 }
 0x875   :  { %v1033_v26 = vpop.eup %1032 }
 0x876   :  { %480 = vrot.lane.b32.xlu0 %v1033_v26, %s1107_s3 }
 0x879   :  { %v1035_v27 = vpop.eup %1034 }
 0x87a   :  { %436 = vrot.lane.b32.xlu1 %v1035_v27, %s1107_s3 }
 0x8e8   :  { %v481_v28 = vpop.permute.xlu0 %480 }
 0x8e9   :  { %v483_v29 = vmul.f32 %v481_v28, %v466_v37 }
 0x8eb   :  { %485 = vrot.lane.b32.xlu2 %v483_v29, %s1108_s21 }
 0x8ec   :  { %v437_v30 = vpop.permute.xlu1 %436 }
 0x8ed   :  { %v439_v38 = vmul.f32 %v437_v30, %v422_v11  ;;  %v125_v11 = vpop.f32.mrf.mxu0 }
 0x8ee   :  { %v126_v13 = vadd.f32 %v1200_v14, %v125_v11 }
 0x8ef   :  { %489 = vrot.lane.b32.xlu0 %v439_v38, %s1107_s3 }
 0x945   :  { %v486_v41 = vpop.permute.xlu2 %485 }
 0x946   :  { %985 = vmatmul.msk.f32.vlgmr.msrb.gmra.mxu3 %vm147_vm4, %v486_v41 }
 0x947   :  { %745 = vmatpush.msrb.mxu3 %v1170_v4 }
 0x949   :  { %746 = vmatpush.msrb.mxu3 %v1177_v6 }
 0x94b   :  { %747 = vmatpush.msrb.mxu3 %v1182_v7 }
 0x94d   :  { %748 = vmatpush.msrb.mxu3 %v1186_v8 }
 0x961   :  { %v490_v42 = vpop.permute.xlu0 %489 }
 0x962   :  { %v492_v43 = vsel %vm147_vm4, %v486_v41, %v490_v42 }
 0x963   :  { %984 = vmatmul.msk.f32.vlgmr.msrb.gmra.mxu1 %vm201_vm5, %v492_v43 }
 0x9c9   :  { %v556_v47 = vpop.f32.mrf.mxu3 }
 0x9ca   :  { %v559_v48 = vadd.f32 %v556_v47, %v123_v45 }
 0x9cc   :  { %v560_v49 = vmul.f32 %v559_v48, %v1203_v17 }
 0x9ce   :  { %1036 = vtanh.f32 %v560_v49 }
 0x9d4   :  { %v1037_v50 = vpop.eup %1036 }
 0x9d5   :  { %v562_v51 = vmul.f32 %v1037_v50, %v1203_v17  ;;  %v60_v50 = vld [vmem:[%s1522_s0 + $0x30] sm:$0xff] }
 0x9d6   :  { %976 = vmatmul.msk.f32.gmra.mxu0 %vm68_vm0, %v60_v50 }
 0x9d7   :  { %v563_v52 = vadd.f32 %v562_v51, %v1206_v22 }
 0x9d9   :  { %566 = vrot.lane.b32.xlu1 %v563_v52, %s1107_s3  ;;  %v564_v1 = vmul.f32 %v563_v52, %v477_v21 }
 0x9e0   :  { %v513_v53 = vpop.f32.mrf.mxu1 }
 0x9e1   :  { %v514_v54 = vadd.f32 %v1320_v46, %v513_v53 }
 0x9e3   :  { %v516_v55 = vmul.f32 %v514_v54, %v1203_v17 }
 0x9e5   :  { %1038 = vtanh.f32 %v516_v55 }
 0x9eb   :  { %v1039_v56 = vpop.eup %1038 }
 0x9ec   :  { %v518_v57 = vmul.f32 %v1039_v56, %v1203_v17 }
 0x9ee   :  { %v519_v58 = vadd.f32 %v518_v57, %v1206_v22 }
 0x9f0   :  { %522 = vrot.lane.b32.xlu2 %v519_v58, %s1107_s3  ;;  %v520_v63 = vmul.f32 %v519_v58, %v433_v25 }
 0xa4a   :  { %v523_v59 = vpop.permute.xlu2 %522 }
 0xa4b   :  { %v525_v60 = vmul.f32 %v523_v59, %v519_v58  ;;  %v567_v61 = vpop.permute.xlu1 %566 }
 0xa4c   :  { %v569_v62 = vmul.f32 %v567_v61, %v563_v52 }
 0xa4d   :  { %527 = vrot.lane.b32.xlu1 %v525_v60, %s1108_s21 }
 0xa4e   :  { %571 = vrot.lane.b32.xlu0 %v569_v62, %s1108_s21 }
 0xa53   :  { %v128_v54 = vpop.f32.mrf.mxu0 }
 0xa54   :  { %v129_v57 = vadd.f32 %v1200_v14, %v128_v54 }
 0xabf   :  { %v528_v0 = vpop.permute.xlu1 %527 }
 0xac0   :  { %v530_v2 = vadd.f32 %v528_v0, %v520_v63  ;;  %v572_v3 = vpop.permute.xlu0 %571 }
 0xac1   :  { %v574_v31 = vadd.f32 %v572_v3, %v564_v1 }
 0xac2   :  { %1040 = vtanh.f32 %v530_v2 }
 0xac3   :  { %1042 = vtanh.f32 %v574_v31 }
 0xac8   :  { %v1041_v5 = vpop.eup %1040 }
 0xac9   :  { %v1043_v9 = vpop.eup %1042  ;;  %533 = vrot.lane.b32.xlu0 %v1041_v5, %s1107_s3 }
 0xaca   :  { %577 = vrot.lane.b32.xlu2 %v1043_v9, %s1107_s3 }
 0xb24   :  { %v578_v32 = vpop.permute.xlu2 %577 }
 0xb25   :  { %v580_v33 = vmul.f32 %v578_v32, %v563_v52 }
 0xb27   :  { %582 = vrot.lane.b32.xlu1 %v580_v33, %s1108_s21 }
 0xb3b   :  { %v534_v34 = vpop.permute.xlu0 %533 }
 0xb3c   :  { %v536_v35 = vmul.f32 %v534_v34, %v519_v58 }
 0xb3e   :  { %586 = vrot.lane.b32.xlu2 %v536_v35, %s1107_s3 }
 0xb98   :  { %v587_v37 = vpop.permute.xlu2 %586 }
 0xb99   :  { %v583_v40 = vpop.permute.xlu1 %582 }
 0xb9a   :  { %v589_v10 = vsel %vm147_vm4, %v583_v40, %v587_v37  ;;  %987 = vmatmul.msk.f32.vlgmr.msra.gmra.mxu3 %vm147_vm4, %v583_v40 }
 0xb9b   :  { %986 = vmatmul.msk.f32.vlgmr.msra.gmra.mxu2 %vm201_vm5, %v589_v10  ;;  %842 = vmatpush.msra.mxu3 %v1170_v4 }
 0xb9d   :  { %843 = vmatpush.msra.mxu3 %v1177_v6 }
 0xb9f   :  { %844 = vmatpush.msra.mxu3 %v1182_v7 }
 0xba1   :  { %845 = vmatpush.msra.mxu3 %v1186_v8 }
 0xc1d   :  { %v653_v15 = vpop.f32.mrf.mxu3 }
 0xc1e   :  { %v656_v16 = vadd.f32 %v653_v15, %v126_v13  ;;  %v610_v18 = vpop.f32.mrf.mxu2 }
 0xc1f   :  { %v611_v19 = vadd.f32 %v1320_v46, %v610_v18 }
 0xc20   :  { %v657_v20 = vmul.f32 %v656_v16, %v1203_v17 }
 0xc21   :  { %v613_v21 = vmul.f32 %v611_v19, %v1203_v17 }
 0xc22   :  { %1044 = vtanh.f32 %v657_v20 }
 0xc23   :  { %1046 = vtanh.f32 %v613_v21 }
 0xc28   :  { %v1045_v4 = vpop.eup %1044 }
 0xc29   :  { %v1047_v6 = vpop.eup %1046  ;;  %v659_v7 = vmul.f32 %v1045_v4, %v1203_v17  ;;  %v132_v4 = vadd.f32 %v1200_v14, %v1195_v12 }
 0xc2a   :  { %v615_v8 = vmul.f32 %v1047_v6, %v1203_v17 }
 0xc2b   :  { %v660_v23 = vadd.f32 %v659_v7, %v1206_v22 }
 0xc2c   :  { %v616_v24 = vadd.f32 %v615_v8, %v1206_v22 }
 0xc2d   :  { %663 = vrot.lane.b32.xlu0 %v660_v23, %s1107_s3  ;;  %v661_v29 = vmul.f32 %v660_v23, %v574_v31 }
 0xc2e   :  { %619 = vrot.lane.b32.xlu1 %v616_v24, %s1107_s3  ;;  %v617_v41 = vmul.f32 %v616_v24, %v530_v2 }
 0xc9f   :  { %v664_v25 = vpop.permute.xlu0 %663 }
 0xca0   :  { %v666_v26 = vmul.f32 %v664_v25, %v660_v23  ;;  %v620_v27 = vpop.permute.xlu1 %619 }
 0xca1   :  { %v622_v28 = vmul.f32 %v620_v27, %v616_v24 }
 0xca2   :  { %668 = vrot.lane.b32.xlu2 %v666_v26, %s1108_s21 }
 0xca3   :  { %624 = vrot.lane.b32.xlu0 %v622_v28, %s1108_s21 }
 0xcfc   :  { %v669_v30 = vpop.permute.xlu2 %668 }
 0xcfd   :  { %v671_v38 = vadd.f32 %v669_v30, %v661_v29 }
 0xcff   :  { %1048 = vtanh.f32 %v671_v38 }
 0xd05   :  { %v1049_v39 = vpop.eup %1048 }
 0xd06   :  { %674 = vrot.lane.b32.xlu1 %v1049_v39, %s1107_s3 }
 0xd15   :  { %v625_v42 = vpop.permute.xlu0 %624 }
 0xd16   :  { %v627_v43 = vadd.f32 %v625_v42, %v617_v41 }
 0xd18   :  { %1050 = vtanh.f32 %v627_v43 }
 0xd1e   :  { %v1051_v44 = vpop.eup %1050 }
 0xd1f   :  { %630 = vrot.lane.b32.xlu2 %v1051_v44, %s1107_s3 }
 0xd78   :  { %v675_v45 = vpop.permute.xlu1 %674 }
 0xd79   :  { %v677_v47 = vmul.f32 %v675_v45, %v660_v23  ;;  %v631_v48 = vpop.permute.xlu2 %630 }
 0xd7a   :  { %v633_v49 = vmul.f32 %v631_v48, %v616_v24 }
 0xd7b   :  { %679 = vrot.lane.b32.xlu0 %v677_v47, %s1108_s21 }
 0xd7c   :  { %683 = vrot.lane.b32.xlu1 %v633_v49, %s1107_s3 }
 0xded   :  { %v680_v51 = vpop.permute.xlu0 %679 }
 0xdee   :  { %989 = vmatmul.msk.f32.vlgmr.msrb.gmra.mxu3 %vm147_vm4, %v680_v51  ;;  %v684_v52 = vpop.permute.xlu1 %683 }
 0xdef   :  { %v686_v53 = vsel %vm147_vm4, %v680_v51, %v684_v52 }
 0xdf0   :  { %988 = vmatmul.msk.f32.vlgmr.msra.gmra.mxu1 %vm201_vm5, %v686_v53 }
 0xe6d   :  { %v707_v55 = vpop.f32.mrf.mxu1 }
 0xe6e   :  { %v708_v56 = vadd.f32 %v1320_v46, %v707_v55 }
 0xe70   :  { %v710_v58 = vmul.f32 %v708_v56, %v1203_v17 }
 0xe71   :  { %v750_v59 = vpop.f32.mrf.mxu3 }
 0xe72   :  { %1052 = vtanh.f32 %v710_v58  ;;  %v753_v60 = vadd.f32 %v750_v59, %v129_v57 }
 0xe74   :  { %v754_v61 = vmul.f32 %v753_v60, %v1203_v17 }
 0xe76   :  { %1054 = vtanh.f32 %v754_v61 }
 0xe78   :  { %v1053_v62 = vpop.eup %1052 }
 0xe79   :  { %v712_v63 = vmul.f32 %v1053_v62, %v1203_v17 }
 0xe7b   :  { %v713_v0 = vadd.f32 %v712_v63, %v1206_v22 }
 0xe7c   :  { %v1055_v1 = vpop.eup %1054 }
 0xe7d   :  { %716 = vrot.lane.b32.xlu2 %v713_v0, %s1107_s3  ;;  %v756_v2 = vmul.f32 %v1055_v1, %v1203_v17  ;;  %v714_v33 = vmul.f32 %v713_v0, %v627_v43 }
 0xe7f   :  { %v757_v3 = vadd.f32 %v756_v2, %v1206_v22 }
 0xe81   :  { %760 = vrot.lane.b32.xlu0 %v757_v3, %s1107_s3  ;;  %v758_v36 = vmul.f32 %v757_v3, %v671_v38 }
 0xed7   :  { %v717_v31 = vpop.permute.xlu2 %716 }
 0xed8   :  { %v719_v5 = vmul.f32 %v717_v31, %v713_v0 }
 0xeda   :  { %721 = vrot.lane.b32.xlu1 %v719_v5, %s1108_s21 }
 0xef3   :  { %v761_v9 = vpop.permute.xlu0 %760 }
 0xef4   :  { %v763_v32 = vmul.f32 %v761_v9, %v757_v3 }
 0xef6   :  { %765 = vrot.lane.b32.xlu2 %v763_v32, %s1108_s21 }
 0xf4c   :  { %v722_v34 = vpop.permute.xlu1 %721 }
 0xf4d   :  { %v724_v35 = vadd.f32 %v722_v34, %v714_v33 }
 0xf4f   :  { %1056 = vtanh.f32 %v724_v35 }
 0xf50   :  { %v766_v37 = vpop.permute.xlu2 %765 }
 0xf51   :  { %v768_v40 = vadd.f32 %v766_v37, %v758_v36 }
 0xf53   :  { %1058 = vtanh.f32 %v768_v40 }
 0xf55   :  { %v1057_v10 = vpop.eup %1056 }
 0xf56   :  { %727 = vrot.lane.b32.xlu0 %v1057_v10, %s1107_s3 }
 0xf59   :  { %v1059_v11 = vpop.eup %1058 }
 0xf5a   :  { %771 = vrot.lane.b32.xlu1 %v1059_v11, %s1107_s3 }
 0xfc8   :  { %v728_v13 = vpop.permute.xlu0 %727 }
 0xfc9   :  { %v730_v15 = vmul.f32 %v728_v13, %v713_v0  ;;  %v1006_v0 = vld [vmem:[%s1528_s6] ss:$0 sm:$0xff] }
 0xfcb   :  { %780 = vrot.lane.b32.xlu0 %v730_v15, %s1107_s3 }
 0xfcc   :  { %v772_v16 = vpop.permute.xlu1 %771 }
 0xfcd   :  { %v774_v18 = vmul.f32 %v772_v16, %v757_v3 }
 0xfcf   :  { %776 = vrot.lane.b32.xlu2 %v774_v18, %s1108_s21 }
0x1029   :  { %v777_v19 = vpop.permute.xlu2 %776 }
0x102a   :  { %991 = vmatmul.msk.f32.vlgmr.msra.gmra.mxu3 %vm147_vm4, %v777_v19 }
0x103d   :  { %v781_v20 = vpop.permute.xlu0 %780 }
0x103e   :  { %v783_v21 = vsel %vm147_vm4, %v777_v19, %v781_v20 }
0x103f   :  { %990 = vmatmul.msk.f32.vlgmr.msrb.gmra.mxu2 %vm201_vm5, %v783_v21 }
0x10ad   :  { %v847_v6 = vpop.f32.mrf.mxu3 }
0x10ae   :  { %v850_v7 = vadd.f32 %v847_v6, %v132_v4 }
0x10b0   :  { %v851_v8 = vmul.f32 %v850_v7, %v1203_v17 }
0x10b2   :  { %1060 = vtanh.f32 %v851_v8 }
0x10b8   :  { %v1061_v23 = vpop.eup %1060 }
0x10b9   :  { %v853_v24 = vmul.f32 %v1061_v23, %v1203_v17 }
0x10bb   :  { %v854_v25 = vadd.f32 %v853_v24, %v1206_v22 }
0x10bd   :  { %857 = vrot.lane.b32.xlu2 %v854_v25, %s1107_s3  ;;  %v855_v42 = vmul.f32 %v854_v25, %v768_v40 }
0x10c2   :  { %v804_v26 = vpop.f32.mrf.mxu2 }
0x10c3   :  { %v805_v27 = vadd.f32 %v1320_v46, %v804_v26 }
0x10c5   :  { %v807_v28 = vmul.f32 %v805_v27, %v1203_v17 }
0x10c7   :  { %1062 = vtanh.f32 %v807_v28 }
0x10cd   :  { %v1063_v29 = vpop.eup %1062 }
0x10ce   :  { %v809_v12 = vmul.f32 %v1063_v29, %v1203_v17 }
0x10d0   :  { %v810_v14 = vadd.f32 %v809_v12, %v1206_v22 }
0x10d2   :  { %813 = vrot.lane.b32.xlu1 %v810_v14, %s1107_s3  ;;  %v811_v47 = vmul.f32 %v810_v14, %v724_v35  ;;  %v1007_v35 = vld [vmem:[#allocation2] ss:$0 sm:$0xff] }
0x1117   :  { %v858_v30 = vpop.permute.xlu2 %857 }
0x1118   :  { %v860_v38 = vmul.f32 %v858_v30, %v854_v25 }
0x111a   :  { %862 = vrot.lane.b32.xlu1 %v860_v38, %s1108_s21 }
0x1144   :  { %v814_v39 = vpop.permute.xlu1 %813 }
0x1145   :  { %v816_v41 = vmul.f32 %v814_v39, %v810_v14 }
0x1147   :  { %818 = vrot.lane.b32.xlu0 %v816_v41, %s1108_s21 }
0x118c   :  { %v863_v43 = vpop.permute.xlu1 %862 }
0x118d   :  { %v865_v44 = vadd.f32 %v863_v43, %v855_v42 }
0x118f   :  { %1064 = vtanh.f32 %v865_v44 }
0x1195   :  { %v1065_v45 = vpop.eup %1064 }
0x1196   :  { %868 = vrot.lane.b32.xlu0 %v1065_v45, %s1107_s3 }
0x11b9   :  { %v819_v48 = vpop.permute.xlu0 %818 }
0x11ba   :  { %v821_v49 = vadd.f32 %v819_v48, %v811_v47 }
0x11bc   :  { %1066 = vtanh.f32 %v821_v49 }
0x11c2   :  { %v1067_v50 = vpop.eup %1066 }
0x11c3   :  { %824 = vrot.lane.b32.xlu2 %v1067_v50, %s1107_s3 }
0x1208   :  { %v869_v51 = vpop.permute.xlu0 %868 }
0x1209   :  { %v871_v52 = vmul.f32 %v869_v51, %v854_v25 }
0x120b   :  { %873 = vrot.lane.b32.xlu1 %v871_v52, %s1108_s21 }
0x121d   :  { %v825_v53 = vpop.permute.xlu2 %824 }
0x121e   :  { %v827_v54 = vmul.f32 %v825_v53, %v810_v14 }
0x1220   :  { %877 = vrot.lane.b32.xlu2 %v827_v54, %s1107_s3 }
0x127a   :  { %v878_v55 = vpop.permute.xlu2 %877 }
0x127d   :  { %v874_v56 = vpop.permute.xlu1 %873 }
0x127e   :  { %v880_v57 = vsel %vm147_vm4, %v874_v56, %v878_v55 }
0x127f   :  { %992 = vmatmul.msk.f32.vlgmr.msrb.gmra.mxu0 %vm201_vm5, %v880_v57 }
0x12fc   :  { %v901_v58 = vpop.f32.mrf.mxu0 }
0x12fd   :  { %v902_v59 = vadd.f32 %v1320_v46, %v901_v58 }
0x12ff   :  { %v904_v60 = vmul.f32 %v902_v59, %v1203_v17 }
0x1301   :  { %1068 = vtanh.f32 %v904_v60 }
0x1307   :  { %v1069_v61 = vpop.eup %1068 }
0x1308   :  { %v906_v62 = vmul.f32 %v1069_v61, %v1203_v17 }
0x130a   :  { %v907_v63 = vadd.f32 %v906_v62, %v1206_v22 }
0x130c   :  { %910 = vrot.lane.b32.xlu0 %v907_v63, %s1107_s3  ;;  %v908_v46 = vmul.f32 %v907_v63, %v821_v49 }
0x1314   :  { %928 = vrot.lane.b32.xlu0 %v1006_v0, %s1109_s27 }
0x137e   :  { %v911_v1 = vpop.permute.xlu0 %910 }
0x137f   :  { %v913_v2 = vmul.f32 %v911_v1, %v907_v63 }
0x1381   :  { %915 = vrot.lane.b32.xlu1 %v913_v2, %s1108_s21 }
0x1386   :  { %v929_v22 = vpop.permute.xlu0 %928 }
0x13f3   :  { %v916_v3 = vpop.permute.xlu1 %915 }
0x13f4   :  { %v918_v31 = vadd.f32 %v916_v3, %v908_v46 }
0x13f6   :  { %1070 = vtanh.f32 %v918_v31 }
0x13fc   :  { %v1071_v5 = vpop.eup %1070 }
0x13fd   :  { %921 = vrot.lane.b32.xlu2 %v1071_v5, %s1107_s3 }
0x1457   :  { %v922_v17 = vpop.permute.xlu2 %921 }
0x1458   :  { %v924_v9 = vmul.f32 %v922_v17, %v907_v63 }
0x145a   :  { %v931_v32 = vmul.f32 %v929_v22, %v924_v9 }
0x145c   :  { %933 = vrot.lane.b32.xlu1 %v931_v32, %s1108_s21 }
0x14ce   :  { %v934_v33 = vpop.permute.xlu1 %933 }
0x14cf   :  { %v936_v34 = vsel %vm147_vm4, %v934_v33, 0.0 }
0x14d0   :  { %937 = vadd.xlane.f32.xlu2 %v936_v34 }
0x1543   :  { %v938_v36 = vpop.xlane.xlu2 %937 }
0x1544   :  { %v943_v37 = vadd.f32 %v1007_v35, %v938_v36 }
0x1546   :  { %v993_v40 = vmul.f32 -1.442695, %v943_v37 }
0x1548   :  { %1072 = vpow2.f32 %v993_v40 }
0x154e   :  { %v1073_v10 = vpop.eup %1072 }
0x154f   :  { %v947_v11 = vadd.f32 1.0, %v1073_v10 }
0x1551   :  { %1074 = vrcp.f32 %v947_v11  ;;  %v959_v18 = vand.u32 2147483648, %v947_v11  ;;  %v957_v20 = vand.u32 2147483647, %v947_v11  ;;  %vm953_vm7 = vweird.f32 %v947_v11 }
0x1553   :  { %v960_v4 = vor.u32 1.1754944e-38, %v959_v18  ;;  %vm958_vm10 = vcmp.eq.f32.partialorder %v957_v20, 8.507059e+37 }
0x1557   :  { %v1075_v13 = vpop.eup %1074 }
0x1558   :  { %v949_v15 = vmul.f32 %v1075_v13, %v947_v11  ;;  %vm954_vm6 = vweird.f32 %v1075_v13 }
0x1559   :  { %vm955_vm9 = vmor %vm953_vm7, %vm954_vm6 }
0x155a   :  { %v950_v16 = vsub.f32 1.0, %v949_v15 }
0x155c   :  { %v951_v19 = vmul.f32 %v1075_v13, %v950_v16 }
0x155e   :  { %v952_v21 = vadd.f32 %v1075_v13, %v951_v19 }
0x1560   :  { %v956_v6 = vsel %vm955_vm9, %v1075_v13, %v952_v21 }
0x1561   :  { %v961_v7 = vsel %vm958_vm10, %v960_v4, %v956_v6 }
0x1562   :  { %964 = vst.msk [vmem:[%s1530_s8] sm:$0xff] %vm963_vm8, %v961_v7 }
0x1563   :  { %969 = vsyncpa [#allocation4], 1 }

</bundles_post_ra>
